<compile_context>
chip_gen: v7x
topology: tpu7x:2x2x1
jax: 0.10.0
libtpu: 0.0.40
codegen_flags: <defaults>
</compile_context>

<pallas_src>
import jax
import jax.numpy as jnp
from jax.experimental import pallas as pl
from jax.experimental.pallas import tpu as pltpu


def _round_up(n, m):
    return ((n + m - 1) // m) * m


def mlp_kernel(x_ref, w1_ref, b1_ref, w2_ref, b2_ref, w3_ref, b3_ref,
               w4_ref, b4_ref, o_ref):
    # f32 x -> bf16 on the VPU; bf16 operands on the MXU; f32 accumulation;
    # bias-add + ReLU in f32 on the VPU, then re-pack to bf16 between layers.
    h = x_ref[...].astype(jnp.bfloat16)

    h = jnp.dot(h, w1_ref[...], preferred_element_type=jnp.float32)
    h = jnp.maximum(h + b1_ref[...], 0.0).astype(jnp.bfloat16)

    h = jnp.dot(h, w2_ref[...], preferred_element_type=jnp.float32)
    h = jnp.maximum(h + b2_ref[...], 0.0).astype(jnp.bfloat16)

    h = jnp.dot(h, w3_ref[...], preferred_element_type=jnp.float32)
    h = jnp.maximum(h + b3_ref[...], 0.0).astype(jnp.bfloat16)

    out = jnp.dot(h, w4_ref[...], preferred_element_type=jnp.float32) + b4_ref[...]
    o_ref[...] = out.astype(o_ref.dtype)


def retargeting_nn_forward(x, params):
    """x: (B, mano_dim) float32.  params: see init_params (bf16 weights, f32 biases)."""
    w1, b1 = params["w1"], params["b1"]
    w2, b2 = params["w2"], params["b2"]
    w3, b3 = params["w3"], params["b3"]
    w4, b4 = params["w4"], params["b4"]

    B, mano_dim = x.shape
    hidden_dim = w1.shape[1]
    robot_dim = w4.shape[1]

    # Batch tiling: one tile when the whole (padded) batch fits comfortably,
    # TB = 1024 above that.  TB only needs to be a multiple of 8 (f32 sublane)
    # since x stays f32 in HBM and is cast in-kernel.
    if B <= 1024:
        TB = _round_up(max(B, 1), 8)
    else:
        TB = 1024
    B_pad = _round_up(B, TB)
    n_tiles = B_pad // TB

    x_in = x
    if B_pad != B:
        x_in = jnp.pad(x, ((0, B_pad - B), (0, 0)))

    weights = (w1, b1, w2, b2, w3, b3, w4, b4)
    # Constant index_maps: each weight/bias is DMA'd once and stays
    # VMEM-resident across all batch tiles of this call.
    weight_specs = [pl.BlockSpec(a.shape, lambda i: (0, 0)) for a in weights]

    flops = 2 * B_pad * (mano_dim * hidden_dim
                         + 2 * hidden_dim * hidden_dim
                         + hidden_dim * robot_dim)
    bytes_accessed = (x_in.size * x_in.dtype.itemsize
                      + sum(w.size * w.dtype.itemsize for w in weights)
                      + B_pad * robot_dim * 4)

    # Only shard across both v7x TensorCores when each core gets enough tiles
    # to amortize its duplicated per-core weight DMA (~1.2 MiB each).
    dim_sem = ("parallel",) if n_tiles >= 4 else ("arbitrary",)

    out = pl.pallas_call(
        mlp_kernel,
        out_shape=jax.ShapeDtypeStruct((B_pad, robot_dim), jnp.float32),
        grid_spec=pltpu.PrefetchScalarGridSpec(
            num_scalar_prefetch=0,
            grid=(n_tiles,),
            in_specs=[pl.BlockSpec((TB, mano_dim), lambda i: (i, 0))] + weight_specs,
            out_specs=pl.BlockSpec((TB, robot_dim), lambda i: (i, 0)),
        ),
        compiler_params=pltpu.CompilerParams(
            dimension_semantics=dim_sem,
            vmem_limit_bytes=32 * 1024 * 1024,   # footprint is only a few MiB
        ),
        cost_estimate=pl.CostEstimate(
            flops=flops, transcendentals=0, bytes_accessed=bytes_accessed),
    )(x_in, *weights)

    if B_pad != B:
        out = out[:B]
    return out


def init_params(key, robot_dim, mano_dim=45, hidden_dim=512):
    """nn.Linear-style init (U[-1/sqrt(fan_in), 1/sqrt(fan_in)]).
    One-time param prep: weights stored transposed vs. PyTorch, shape
    (in, out), bf16.  Biases kept 2D (1, out), f32 (added to the f32
    accumulator).  No per-forward-call transforms remain."""
    dims = [(mano_dim, hidden_dim), (hidden_dim, hidden_dim),
            (hidden_dim, hidden_dim), (hidden_dim, robot_dim)]
    params = {}
    keys = jax.random.split(key, 2 * len(dims))
    for i, (fan_in, fan_out) in enumerate(dims):
        bound = 1.0 / (fan_in ** 0.5)
        w = jax.random.uniform(keys[2 * i], (fan_in, fan_out),
                               minval=-bound, maxval=bound, dtype=jnp.float32)
        b = jax.random.uniform(keys[2 * i + 1], (1, fan_out),
                               minval=-bound, maxval=bound, dtype=jnp.float32)
        params[f"w{i + 1}"] = w.astype(jnp.bfloat16)
        params[f"b{i + 1}"] = b
    return params


def reference_forward(x, params):
    """Pure-JAX reference with the same mixed precision as the kernel
    (bf16 operands, f32 accumulation) — equal to the PyTorch f32 module up to
    bf16 rounding of weights/activations."""
    h = x.astype(jnp.bfloat16)
    for i in (1, 2, 3):
        h = jnp.dot(h, params[f"w{i}"],
                    preferred_element_type=jnp.float32) + params[f"b{i}"]
        h = jnp.maximum(h, 0.0).astype(jnp.bfloat16)
    return jnp.dot(h, params["w4"],
                   preferred_element_type=jnp.float32) + params["b4"]


if __name__ == "__main__":
    key = jax.random.PRNGKey(0)
    k_param, k_x = jax.random.split(key)

    batch = 8
    mano_dim = 45
    hidden_dim = 512
    robot_dim = 16

    params = init_params(k_param, robot_dim, mano_dim, hidden_dim)
    x = jax.random.normal(k_x, (batch, mano_dim), dtype=jnp.float32)

    out = retargeting_nn_forward(x, params)
    out = jax.block_until_ready(out)

    ref = reference_forward(x, params)
    assert out.shape == (batch, robot_dim)
    assert jnp.allclose(out, ref, atol=1e-2, rtol=1e-2), \
        float(jnp.max(jnp.abs(out - ref)))

    print("KERNEL_OK")
</pallas_src>

<mosaic_0001>
module attributes {stable_mosaic.version = 11 : i64} {
  func.func @mlp_kernel(%arg0: i32, %arg1: memref<8x45xf32, #tpu.memory_space<vmem>>, %arg2: memref<45x512xbf16, #tpu.memory_space<vmem>>, %arg3: memref<1x512xf32, #tpu.memory_space<vmem>>, %arg4: memref<512x512xbf16, #tpu.memory_space<vmem>>, %arg5: memref<1x512xf32, #tpu.memory_space<vmem>>, %arg6: memref<512x512xbf16, #tpu.memory_space<vmem>>, %arg7: memref<1x512xf32, #tpu.memory_space<vmem>>, %arg8: memref<512x16xbf16, #tpu.memory_space<vmem>>, %arg9: memref<1x16xf32, #tpu.memory_space<vmem>>, %arg10: memref<8x16xf32, #tpu.memory_space<vmem>>) attributes {dimension_semantics = [#tpu.dimension_semantics<arbitrary>], iteration_bounds = array<i64: 1>, scalar_prefetch = 0 : i64, scratch_operands = 0 : i64, tpu.core_type = #tpu.core_type<tc>, window_params = [{transform_indices = @transform_0, window_bounds = array<i64: 8, 45>}, {pipeline_mode = #tpu.pipeline_mode<synchronous>, transform_indices = @transform_1, window_bounds = array<i64: 45, 512>}, {pipeline_mode = #tpu.pipeline_mode<synchronous>, transform_indices = @transform_2, window_bounds = array<i64: 1, 512>}, {pipeline_mode = #tpu.pipeline_mode<synchronous>, transform_indices = @transform_3, window_bounds = array<i64: 512, 512>}, {pipeline_mode = #tpu.pipeline_mode<synchronous>, transform_indices = @transform_4, window_bounds = array<i64: 1, 512>}, {pipeline_mode = #tpu.pipeline_mode<synchronous>, transform_indices = @transform_5, window_bounds = array<i64: 512, 512>}, {pipeline_mode = #tpu.pipeline_mode<synchronous>, transform_indices = @transform_6, window_bounds = array<i64: 1, 512>}, {pipeline_mode = #tpu.pipeline_mode<synchronous>, transform_indices = @transform_7, window_bounds = array<i64: 512, 16>}, {pipeline_mode = #tpu.pipeline_mode<synchronous>, transform_indices = @transform_8, window_bounds = array<i64: 1, 16>}, {transform_indices = @transform_9, window_bounds = array<i64: 8, 16>}]} {
    %c0 = arith.constant 0 : index
    %c0_0 = arith.constant 0 : index
    %0 = vector.load %arg1[%c0, %c0_0] : memref<8x45xf32, #tpu.memory_space<vmem>>, vector<8x45xf32>
    %1 = arith.truncf %0 : vector<8x45xf32> to vector<8x45xbf16>
    %c0_1 = arith.constant 0 : index
    %c0_2 = arith.constant 0 : index
    %2 = vector.load %arg2[%c0_1, %c0_2] : memref<45x512xbf16, #tpu.memory_space<vmem>>, vector<45x512xbf16>
    %cst = arith.constant dense<0.000000e+00> : vector<8x512xf32>
    %3 = tpu.matmul %1, %2, %cst {dimension_numbers = #tpu.dot_dimension_numbers<[1], [0], [0], [1], [0, 0, 1, 1], [], []>} : vector<8x45xbf16>, vector<45x512xbf16>, vector<8x512xf32> -> vector<8x512xf32>
    %c0_3 = arith.constant 0 : index
    %c0_4 = arith.constant 0 : index
    %4 = vector.load %arg3[%c0_3, %c0_4] : memref<1x512xf32, #tpu.memory_space<vmem>>, vector<1x512xf32>
    %5 = vector.broadcast %4 : vector<1x512xf32> to vector<8x512xf32>
    %6 = arith.addf %3, %5 : vector<8x512xf32>
    %cst_5 = arith.constant 0.000000e+00 : f32
    %7 = vector.broadcast %cst_5 : f32 to vector<8x512xf32>
    %8 = arith.maximumf %6, %7 : vector<8x512xf32>
    %9 = arith.truncf %8 : vector<8x512xf32> to vector<8x512xbf16>
    %c0_6 = arith.constant 0 : index
    %c0_7 = arith.constant 0 : index
    %10 = vector.load %arg4[%c0_6, %c0_7] : memref<512x512xbf16, #tpu.memory_space<vmem>>, vector<512x512xbf16>
    %cst_8 = arith.constant dense<0.000000e+00> : vector<8x512xf32>
    %11 = tpu.matmul %9, %10, %cst_8 {dimension_numbers = #tpu.dot_dimension_numbers<[1], [0], [0], [1], [0, 0, 1, 1], [], []>} : vector<8x512xbf16>, vector<512x512xbf16>, vector<8x512xf32> -> vector<8x512xf32>
    %c0_9 = arith.constant 0 : index
    %c0_10 = arith.constant 0 : index
    %12 = vector.load %arg5[%c0_9, %c0_10] : memref<1x512xf32, #tpu.memory_space<vmem>>, vector<1x512xf32>
    %13 = vector.broadcast %12 : vector<1x512xf32> to vector<8x512xf32>
    %14 = arith.addf %11, %13 : vector<8x512xf32>
    %cst_11 = arith.constant 0.000000e+00 : f32
    %15 = vector.broadcast %cst_11 : f32 to vector<8x512xf32>
    %16 = arith.maximumf %14, %15 : vector<8x512xf32>
    %17 = arith.truncf %16 : vector<8x512xf32> to vector<8x512xbf16>
    %c0_12 = arith.constant 0 : index
    %c0_13 = arith.constant 0 : index
    %18 = vector.load %arg6[%c0_12, %c0_13] : memref<512x512xbf16, #tpu.memory_space<vmem>>, vector<512x512xbf16>
    %cst_14 = arith.constant dense<0.000000e+00> : vector<8x512xf32>
    %19 = tpu.matmul %17, %18, %cst_14 {dimension_numbers = #tpu.dot_dimension_numbers<[1], [0], [0], [1], [0, 0, 1, 1], [], []>} : vector<8x512xbf16>, vector<512x512xbf16>, vector<8x512xf32> -> vector<8x512xf32>
    %c0_15 = arith.constant 0 : index
    %c0_16 = arith.constant 0 : index
    %20 = vector.load %arg7[%c0_15, %c0_16] : memref<1x512xf32, #tpu.memory_space<vmem>>, vector<1x512xf32>
    %21 = vector.broadcast %20 : vector<1x512xf32> to vector<8x512xf32>
    %22 = arith.addf %19, %21 : vector<8x512xf32>
    %cst_17 = arith.constant 0.000000e+00 : f32
    %23 = vector.broadcast %cst_17 : f32 to vector<8x512xf32>
    %24 = arith.maximumf %22, %23 : vector<8x512xf32>
    %25 = arith.truncf %24 : vector<8x512xf32> to vector<8x512xbf16>
    %c0_18 = arith.constant 0 : index
    %c0_19 = arith.constant 0 : index
    %26 = vector.load %arg8[%c0_18, %c0_19] : memref<512x16xbf16, #tpu.memory_space<vmem>>, vector<512x16xbf16>
    %cst_20 = arith.constant dense<0.000000e+00> : vector<8x16xf32>
    %27 = tpu.matmul %25, %26, %cst_20 {dimension_numbers = #tpu.dot_dimension_numbers<[1], [0], [0], [1], [0, 0, 1, 1], [], []>} : vector<8x512xbf16>, vector<512x16xbf16>, vector<8x16xf32> -> vector<8x16xf32>
    %c0_21 = arith.constant 0 : index
    %c0_22 = arith.constant 0 : index
    %28 = vector.load %arg9[%c0_21, %c0_22] : memref<1x16xf32, #tpu.memory_space<vmem>>, vector<1x16xf32>
    %29 = vector.broadcast %28 : vector<1x16xf32> to vector<8x16xf32>
    %30 = arith.addf %27, %29 : vector<8x16xf32>
    %c0_23 = arith.constant 0 : index
    %c0_24 = arith.constant 0 : index
    %31 = vector.load %arg10[%c0_23, %c0_24] : memref<8x16xf32, #tpu.memory_space<vmem>>, vector<8x16xf32>
    tpu.vector_store %arg10[%c0_23, %c0_24], %30 {strides = array<i32>} : memref<8x16xf32, #tpu.memory_space<vmem>>, vector<8x16xf32>,
    return
  }
  func.func @transform_0(%arg0: i32) -> (i32, i32) {
    %c0_i32 = arith.constant 0 : i32
    %c0_i32_0 = arith.constant 0 : i32
    return %arg0, %c0_i32 : i32, i32
  }
  func.func @transform_1(%arg0: i32) -> (i32, i32) {
    %c0_i32 = arith.constant 0 : i32
    %c0_i32_0 = arith.constant 0 : i32
    %c0_i32_1 = arith.constant 0 : i32
    return %c0_i32, %c0_i32_0 : i32, i32
  }
  func.func @transform_2(%arg0: i32) -> (i32, i32) {
    %c0_i32 = arith.constant 0 : i32
    %c0_i32_0 = arith.constant 0 : i32
    %c0_i32_1 = arith.constant 0 : i32
    return %c0_i32, %c0_i32_0 : i32, i32
  }
  func.func @transform_3(%arg0: i32) -> (i32, i32) {
    %c0_i32 = arith.constant 0 : i32
    %c0_i32_0 = arith.constant 0 : i32
    %c0_i32_1 = arith.constant 0 : i32
    return %c0_i32, %c0_i32_0 : i32, i32
  }
  func.func @transform_4(%arg0: i32) -> (i32, i32) {
    %c0_i32 = arith.constant 0 : i32
    %c0_i32_0 = arith.constant 0 : i32
    %c0_i32_1 = arith.constant 0 : i32
    return %c0_i32, %c0_i32_0 : i32, i32
  }
  func.func @transform_5(%arg0: i32) -> (i32, i32) {
    %c0_i32 = arith.constant 0 : i32
    %c0_i32_0 = arith.constant 0 : i32
    %c0_i32_1 = arith.constant 0 : i32
    return %c0_i32, %c0_i32_0 : i32, i32
  }
  func.func @transform_6(%arg0: i32) -> (i32, i32) {
    %c0_i32 = arith.constant 0 : i32
    %c0_i32_0 = arith.constant 0 : i32
    %c0_i32_1 = arith.constant 0 : i32
    return %c0_i32, %c0_i32_0 : i32, i32
  }
  func.func @transform_7(%arg0: i32) -> (i32, i32) {
    %c0_i32 = arith.constant 0 : i32
    %c0_i32_0 = arith.constant 0 : i32
    %c0_i32_1 = arith.constant 0 : i32
    return %c0_i32, %c0_i32_0 : i32, i32
  }
  func.func @transform_8(%arg0: i32) -> (i32, i32) {
    %c0_i32 = arith.constant 0 : i32
    %c0_i32_0 = arith.constant 0 : i32
    %c0_i32_1 = arith.constant 0 : i32
    return %c0_i32, %c0_i32_0 : i32, i32
  }
  func.func @transform_9(%arg0: i32) -> (i32, i32) {
    %c0_i32 = arith.constant 0 : i32
    %c0_i32_0 = arith.constant 0 : i32
    return %arg0, %c0_i32 : i32, i32
  }
}

</mosaic_0001>

<bundles_post_ra>
// kernel: tpu_custom_call.1
= control target key start
LH: loop header
LB: loop body
LE: loop exit
PB: predicated region body
PF: predicated region fallthrough
CT: control target
= control target key end

     0   :  { %14 = vsyncpa [#allocation3], 0  ;;  %s3719_s0 = inlined_call_operand.vmem [shape: f32[8,45], index: 0, kind: input, shape index: {}]   ;;  %s3720_s1 = inlined_call_operand.vmem [shape: bf16[45,512], index: 1, kind: input, shape index: {}]   ;;  %s3721_s2 = inlined_call_operand.vmem [shape: f32[1,512], index: 2, kind: input, shape index: {}]   ;;  %s3722_s3 = inlined_call_operand.hbm [shape: bf16[512,512], index: 3, kind: input, shape index: {}]   ;;  %s3723_s4 = inlined_call_operand.vmem [shape: f32[1,512], index: 4, kind: input, shape index: {}]   ;;  %s3724_s5 = inlined_call_operand.hbm [shape: bf16[512,512], index: 5, kind: input, shape index: {}]   ;;  %s3725_s6 = inlined_call_operand.vmem [shape: f32[1,512], index: 6, kind: input, shape index: {}]   ;;  %s3726_s7 = inlined_call_operand.vmem [shape: bf16[512,16], index: 7, kind: input, shape index: {}]   ;;  %s3727_s8 = inlined_call_operand.vmem [shape: f32[1,16], index: 8, kind: input, shape index: {}]   ;;  %s3728_s9 = inlined_call_operand.hbm [shape: f32[8,16], index: 9, kind: output, shape index: {}]  }
   0x1   :  { %15 = vsyncpa [#allocation6], 0 }
   0x2   :  { %16 = vsyncpa [#allocation4], 0  ;;  %s3433_s30 = smov [#allocation2]   ;;  %s3361_s13 = scalar_lea.hbm %s3722_s3, 16384 }
   0x3   :  { %s28_s10 = sshll.u32 %s3433_s30, 4  ;;  %p3362_p0 = scmp.ne.s32.totalorder %s3722_s3, %s3361_s13  ;;  %s29_s10 = int_to_ptr.vmem [resolvable:$true] %s28_s10 }
   0x4   :  { %p3365_p1 = scmp.lt.u32.totalorder %s3361_s13, %s3722_s3 }
   0x6   :  { %p3367_p2 = pnand %p3365_p1, %p3362_p0 }
   0x8   :  { %3370 = shalt.err (!%p3367_p2)
}
   0x9   :  { %s3371_s18 = scalar_lea.vmem %s29_s10, 16384  ;;  %p3376_p4 = scmp.lt.s32.totalorder %s29_s10, %s29_s10 }
   0xa   :  { %p3372_p3 = scmp.ne.s32.totalorder %s29_s10, %s3371_s18  ;;  %p3377_p5 = scmp.lt.s32.totalorder %s3371_s18, %s3371_s18 }
   0xc   :  { %p3378_p6 = por %p3377_p5, %p3376_p4 }
   0xe   :  { %p3379_p7 = pnand %p3378_p6, %p3372_p3 }
  0x10   :  { %3382 = shalt.err (!%p3379_p7)
}
  0x11   :  { %s3434_s19 = smov 256   ;;  %s3435_s20 = smov 16  }
  0x12   :  { %34 = dma.hbm_to_vmem [thread:$0]  %s3722_s3, 16384, %s29_s10, [#allocation3], %s3434_s19, %s3434_s19, %s3435_s20  }
  0x13   :  { %s3436_s23 = smov [#allocation5]   ;;  %s3383_s27 = scalar_lea.hbm %s3724_s5, 16384 }
  0x14   :  { %s42_s24 = sshll.u32 %s3436_s23, 4  ;;  %p3384_p8 = scmp.ne.s32.totalorder %s3724_s5, %s3383_s27  ;;  %s43_s24 = int_to_ptr.vmem [resolvable:$true] %s42_s24 }
  0x15   :  { %p3387_p9 = scmp.lt.u32.totalorder %s3383_s27, %s3724_s5 }
  0x17   :  { %p3389_p10 = pnand %p3387_p9, %p3384_p8 }
  0x19   :  { %3392 = shalt.err (!%p3389_p10)
}
  0x1a   :  { %s3393_s12 = scalar_lea.vmem %s43_s24, 16384  ;;  %p3398_p12 = scmp.lt.s32.totalorder %s43_s24, %s43_s24 }
  0x1b   :  { %p3394_p11 = scmp.ne.s32.totalorder %s43_s24, %s3393_s12  ;;  %p3399_p13 = scmp.lt.s32.totalorder %s3393_s12, %s3393_s12 }
  0x1d   :  { %p3400_p0 = por %p3399_p13, %p3398_p12 }
  0x1f   :  { %p3401_p1 = pnand %p3400_p0, %p3394_p11 }
  0x21   :  { %3404 = shalt.err (!%p3401_p1)
}
  0x22   :  { %48 = dma.hbm_to_vmem [thread:$0]  %s3724_s5, 16384, %s43_s24, [#allocation6], %s3434_s19, %s3434_s19, %s3435_s20  }
  0x23   :  { %3427 = dma.done.wait [#allocation3], 16384  }
  0x24   :  { %3428 = vsyncadd [#allocation3], 4294950912 }
  0x25   :  { %3429 = dma.done.wait [#allocation6], 16384  }
  0x26   :  { %3430 = vsyncadd [#allocation6], 4294950912  ;;  %v3437_v0 = vmov 0   ;;  %vm158_vm0 = vcmask 1045504   ;;  %vm159_vm1 = vcmask 1046528   ;;  %v3438_v1 = vmov 65535  }
  0x27   :  { %206 = vmatprep.mubr.bf16.mxu0 %v3437_v0  ;;  %247 = vmatprep.mubr.bf16.mxu1 %v3437_v0  ;;  %v160_v2 = vsel %vm158_vm0, 4294967295, %v3438_v1  ;;  %v2927_v3 = vld [vmem:[%s3720_s1 + $0x4] ss:$16 sps:$4 sm:$0xff]   ;;  %v2929_v4 = vld [vmem:[%s3720_s1] ss:$16 sps:$4 sm:$0xff]   ;;  %vm154_vm2 = vcmask 367616  }
  0x28   :  { %174 = vmatprep.subr.bf16.mxu0 %v2927_v3  ;;  %v2930_v5 = vld [vmem:[%s3720_s1 + $0x24] ss:$16 sps:$4 sm:$0xff]   ;;  %v2932_v6 = vld [vmem:[%s3720_s1 + $0x20] ss:$16 sps:$4 sm:$0xff]   ;;  %v161_v7 = vsel %vm159_vm1, %v160_v2, 0  ;;  %s3439_s27 = smov [#allocation7]  }
  0x29   :  { %175 = vmatpush1.bf16.msra.mxu0 %v2929_v4  ;;  %v2933_v8 = vld [vmem:[%s3720_s1 + $0x44] ss:$16 sps:$4 sm:$0x7f]   ;;  %v2935_v9 = vld [vmem:[%s3720_s1 + $0x40] ss:$16 sps:$4 sm:$0x7f]  }
  0x2a   :  { %176 = vmatprep.subr.bf16.mxu0 %v2930_v5  ;;  %v166_v10 = vand.u32 %v2933_v8, %v161_v7  ;;  %v62_v11 = vld [vmem:[%s3719_s0] sm:$0xff]  ;;  %v2936_v12 = vld [vmem:[%s3720_s1 + $0xc] ss:$16 sps:$4 sm:$0xff]   ;;  %v2938_v13 = vld [vmem:[%s3720_s1 + $0x8] ss:$16 sps:$4 sm:$0xff]   ;;  %v163_v16 = vand.u32 %v2935_v9, %v161_v7  ;;  %s2539_s28 = sshll.u32 %s3439_s27, 4  ;;  %s2540_s28 = int_to_ptr.vmem [resolvable:$true] %s2539_s28 }
  0x2b   :  { %v2939_v14 = vld [vmem:[%s3720_s1 + $0x2c] ss:$16 sps:$4 sm:$0xff]   ;;  %v2941_v15 = vld [vmem:[%s3720_s1 + $0x28] ss:$16 sps:$4 sm:$0xff]   ;;  %215 = vmatprep.subr.bf16.mxu1 %v2936_v12  ;;  %v2947_v20 = vld [vmem:[#allocation2 + $0x4] ss:$16 sps:$4 sm:$0xff]   ;;  %v63_v21 = vpack.c.bf16 %v62_v11, %v62_v11  ;;  %p3410_p3 = scmp.lt.s32.totalorder %s2540_s28, %s2540_s28 }
  0x2c   :  { %v2942_v17 = vld [vmem:[%s3720_s1 + $0x4c] ss:$16 sps:$4 sm:$0x7f]   ;;  %216 = vmatpush1.bf16.msra.mxu1 %v2938_v13  ;;  %v2944_v18 = vld [vmem:[%s3720_s1 + $0x48] ss:$16 sps:$4 sm:$0x7f]  }
  0x2d   :  { %177 = vmatpush1.bf16.msra.mxu0 %v2932_v6  ;;  %217 = vmatprep.subr.bf16.mxu1 %v2939_v14  ;;  %v172_v19 = vand.u32 %v2942_v17, %v161_v7  ;;  %v2945_v22 = vld [vmem:[#allocation2] ss:$16 sps:$4 sm:$0xff]   ;;  %v169_v23 = vand.u32 %v2944_v18, %v161_v7  ;;  %v2953_v24 = vld [vmem:[#allocation2 + $0x24] ss:$16 sps:$4 sm:$0xff]   ;;  %v2950_v25 = vld [vmem:[#allocation2 + $0xc] ss:$16 sps:$4 sm:$0xff]  }
  0x2e   :  { %178 = vmatprep.subr.bf16.mxu0 %v166_v10  ;;  %v2948_v26 = vld [vmem:[#allocation2 + $0x8] ss:$16 sps:$4 sm:$0xff]   ;;  %v2951_v27 = vld [vmem:[#allocation2 + $0x20] ss:$16 sps:$4 sm:$0xff]   ;;  %v2959_v28 = vld [vmem:[#allocation2 + $0x44] ss:$16 sps:$4 sm:$0xff]  }
  0x2f   :  { %v2956_v29 = vld [vmem:[#allocation2 + $0x2c] ss:$16 sps:$4 sm:$0xff]   ;;  %v2954_v30 = vld [vmem:[#allocation2 + $0x28] ss:$16 sps:$4 sm:$0xff]   ;;  %v2957_v31 = vld [vmem:[#allocation2 + $0x40] ss:$16 sps:$4 sm:$0xff]  }
  0x30   :  { %218 = vmatpush1.bf16.msra.mxu1 %v2941_v15  ;;  %v2965_v32 = vld [vmem:[#allocation2 + $0x64] ss:$16 sps:$4 sm:$0xff]   ;;  %v2962_v33 = vld [vmem:[#allocation2 + $0x4c] ss:$16 sps:$4 sm:$0xff]   ;;  %v2960_v34 = vld [vmem:[#allocation2 + $0x48] ss:$16 sps:$4 sm:$0xff]  }
  0x31   :  { %179 = vmatpush1.bf16.msra.mxu0 %v163_v16  ;;  %219 = vmatprep.subr.bf16.mxu1 %v172_v19  ;;  %v2963_v35 = vld [vmem:[#allocation2 + $0x60] ss:$16 sps:$4 sm:$0xff]   ;;  %v2971_v36 = vld [vmem:[#allocation2 + $0x84] ss:$16 sps:$4 sm:$0xff]   ;;  %v2968_v37 = vld [vmem:[#allocation2 + $0x6c] ss:$16 sps:$4 sm:$0xff]  }
  0x32   :  { %1054 = vmatprep.subr.bf16.mxu0 %v2947_v20  ;;  %v2966_v38 = vld [vmem:[#allocation2 + $0x68] ss:$16 sps:$4 sm:$0xff]   ;;  %v2969_v39 = vld [vmem:[#allocation2 + $0x80] ss:$16 sps:$4 sm:$0xff]   ;;  %v2977_v40 = vld [vmem:[#allocation2 + $0xa4] ss:$16 sps:$4 sm:$0xff]  }
  0x33   :  { %v2974_v41 = vld [vmem:[#allocation2 + $0x8c] ss:$16 sps:$4 sm:$0xff]   ;;  %v2972_v42 = vld [vmem:[#allocation2 + $0x88] ss:$16 sps:$4 sm:$0xff]   ;;  %v2975_v43 = vld [vmem:[#allocation2 + $0xa0] ss:$16 sps:$4 sm:$0xff]  }
  0x34   :  { %2561 = vmatmul.mubr.msk.bf16.vlgmr.msra.gmra.mrb[0].mxu0 %vm154_vm2, %v63_v21  ;;  %220 = vmatpush1.bf16.msra.mxu1 %v169_v23  ;;  %v2983_v44 = vld [vmem:[#allocation2 + $0xc4] ss:$16 sps:$4 sm:$0xff]   ;;  %v2980_v45 = vld [vmem:[#allocation2 + $0xac] ss:$16 sps:$4 sm:$0xff]   ;;  %v2978_v46 = vld [vmem:[#allocation2 + $0xa8] ss:$16 sps:$4 sm:$0xff]  }
  0x35   :  { %1055 = vmatpush1.bf16.msra.mxu0 %v2945_v22  ;;  %1136 = vmatprep.subr.bf16.mxu1 %v2950_v25  ;;  %v2981_v47 = vld [vmem:[#allocation2 + $0xc0] ss:$16 sps:$4 sm:$0xff]   ;;  %v2989_v48 = vld [vmem:[#allocation2 + $0xe4] ss:$16 sps:$4 sm:$0xff]   ;;  %v2986_v49 = vld [vmem:[#allocation2 + $0xcc] ss:$16 sps:$4 sm:$0xff]  }
  0x36   :  { %1056 = vmatprep.subr.bf16.mxu0 %v2953_v24  ;;  %v2984_v50 = vld [vmem:[#allocation2 + $0xc8] ss:$16 sps:$4 sm:$0xff]   ;;  %v2987_v51 = vld [vmem:[#allocation2 + $0xe0] ss:$16 sps:$4 sm:$0xff]   ;;  %v2995_v52 = vld [vmem:[#allocation2 + $0x104] ss:$16 sps:$4 sm:$0xff]   ;;  %v78_v24 = vlaneseq }
  0x37   :  { %2562 = vmatmul.mubr.msk.bf16.vlgmr.msra.gmra.mrb[0].mxu1 %vm154_vm2, %v63_v21  ;;  %v2992_v53 = vld [vmem:[#allocation2 + $0xec] ss:$16 sps:$4 sm:$0xff]   ;;  %v2990_v54 = vld [vmem:[#allocation2 + $0xe8] ss:$16 sps:$4 sm:$0xff]   ;;  %v2993_v55 = vld [vmem:[#allocation2 + $0x100] ss:$16 sps:$4 sm:$0xff]  }
  0x38   :  { %1137 = vmatpush1.bf16.msra.mxu1 %v2948_v26  ;;  %v3001_v56 = vld [vmem:[#allocation2 + $0x124] ss:$16 sps:$4 sm:$0xff]   ;;  %v2998_v57 = vld [vmem:[#allocation2 + $0x10c] ss:$16 sps:$4 sm:$0xff]   ;;  %v2999_v58 = vld [vmem:[#allocation2 + $0x120] ss:$16 sps:$4 sm:$0xff]  }
  0x39   :  { %1057 = vmatpush1.bf16.msra.mxu0 %v2951_v27  ;;  %1138 = vmatprep.subr.bf16.mxu1 %v2956_v29  ;;  %v2996_v59 = vld [vmem:[#allocation2 + $0x108] ss:$16 sps:$4 sm:$0xff]   ;;  %v3007_v60 = vld [vmem:[#allocation2 + $0x144] ss:$16 sps:$4 sm:$0xff]   ;;  %v3004_v61 = vld [vmem:[#allocation2 + $0x12c] ss:$16 sps:$4 sm:$0xff]  }
  0x3a   :  { %1058 = vmatprep.subr.bf16.mxu0 %v2959_v28  ;;  %v3005_v62 = vld [vmem:[#allocation2 + $0x140] ss:$16 sps:$4 sm:$0xff]   ;;  %v3002_v63 = vld [vmem:[#allocation2 + $0x128] ss:$16 sps:$4 sm:$0xff]   ;;  %v3013_v0 = vld [vmem:[#allocation2 + $0x164] ss:$16 sps:$4 sm:$0xff]  }
  0x3b   :  { %v3010_v1 = vld [vmem:[#allocation2 + $0x14c] ss:$16 sps:$4 sm:$0xff]   ;;  %v3011_v2 = vld [vmem:[#allocation2 + $0x160] ss:$16 sps:$4 sm:$0xff]   ;;  %v3008_v3 = vld [vmem:[#allocation2 + $0x148] ss:$16 sps:$4 sm:$0xff]  }
  0x3c   :  { %1139 = vmatpush1.bf16.msra.mxu1 %v2954_v30  ;;  %v3019_v4 = vld [vmem:[#allocation2 + $0x184] ss:$16 sps:$4 sm:$0xff]   ;;  %v3016_v5 = vld [vmem:[#allocation2 + $0x16c] ss:$16 sps:$4 sm:$0xff]   ;;  %v3017_v6 = vld [vmem:[#allocation2 + $0x180] ss:$16 sps:$4 sm:$0xff]  }
  0x3d   :  { %1059 = vmatpush1.bf16.msra.mxu0 %v2957_v31  ;;  %1140 = vmatprep.subr.bf16.mxu1 %v2962_v33  ;;  %v3014_v7 = vld [vmem:[#allocation2 + $0x168] ss:$16 sps:$4 sm:$0xff]   ;;  %v3025_v8 = vld [vmem:[#allocation2 + $0x1a4] ss:$16 sps:$4 sm:$0xff]   ;;  %v3022_v9 = vld [vmem:[#allocation2 + $0x18c] ss:$16 sps:$4 sm:$0xff]  }
  0x3e   :  { %1060 = vmatprep.subr.bf16.mxu0 %v2965_v32  ;;  %v3023_v10 = vld [vmem:[#allocation2 + $0x1a0] ss:$16 sps:$4 sm:$0xff]   ;;  %v3020_v11 = vld [vmem:[#allocation2 + $0x188] ss:$16 sps:$4 sm:$0xff]   ;;  %v3028_v12 = vld [vmem:[#allocation2 + $0x1ac] ss:$16 sps:$4 sm:$0xff]  }
  0x3f   :  { %v3026_v13 = vld [vmem:[#allocation2 + $0x1a8] ss:$16 sps:$4 sm:$0xff]   ;;  %v3031_v14 = vld [vmem:[#allocation2 + $0x1c4] ss:$16 sps:$4 sm:$0xff]   ;;  %v3034_v15 = vld [vmem:[#allocation2 + $0x1cc] ss:$16 sps:$4 sm:$0xff]  }
  0x40   :  { %1141 = vmatpush1.bf16.msra.mxu1 %v2960_v34  ;;  %v3029_v16 = vld [vmem:[#allocation2 + $0x1c0] ss:$16 sps:$4 sm:$0xff]   ;;  %v3032_v17 = vld [vmem:[#allocation2 + $0x1c8] ss:$16 sps:$4 sm:$0xff]   ;;  %v3037_v18 = vld [vmem:[#allocation2 + $0x1e4] ss:$16 sps:$4 sm:$0xff]  }
  0x41   :  { %1061 = vmatpush1.bf16.msra.mxu0 %v2963_v35  ;;  %1142 = vmatprep.subr.bf16.mxu1 %v2968_v37  ;;  %v3040_v19 = vld [vmem:[#allocation2 + $0x1ec] ss:$16 sps:$4 sm:$0xff]   ;;  %v3035_v20 = vld [vmem:[#allocation2 + $0x1e0] ss:$16 sps:$4 sm:$0xff]   ;;  %v3038_v21 = vld [vmem:[#allocation2 + $0x1e8] ss:$16 sps:$4 sm:$0xff]  }
  0x42   :  { %1062 = vmatprep.subr.bf16.mxu0 %v2971_v36  ;;  %v3043_v22 = vld [vmem:[#allocation2 + $0x204] ss:$16 sps:$4 sm:$0xff]   ;;  %v3046_v23 = vld [vmem:[#allocation2 + $0x20c] ss:$16 sps:$4 sm:$0xff]   ;;  %v3555_v25 = vshrl.u32 %v78_v24, 7  ;;  %vm2531_vm3 = vcmask 130048  }
  0x43   :  { %v3563_v27 = vld [vmem:[%s3721_s2] sm:$0xf]  ;;  %v3103_v24 = vld [vmem:[#allocation2 + $0x344] ss:$16 sps:$4 sm:$0xff]   ;;  %s3405_s29 = scalar_lea.vmem %s2540_s28, 128 }
  0x44   :  { %1143 = vmatpush1.bf16.msra.mxu1 %v2966_v38  ;;  %v3558_v26 = vsub.s32 0, %v3555_v25  ;;  %v3566_v28 = vsub.s32 1, %v3555_v25  ;;  %v3573_v31 = vsub.s32 3, %v3555_v25  ;;  %p3406_p2 = scmp.ne.s32.totalorder %s2540_s28, %s3405_s29  ;;  %p3411_p4 = scmp.lt.s32.totalorder %s3405_s29, %s3405_s29 }
  0x45   :  { %1063 = vmatpush1.bf16.msra.mxu0 %v2969_v39  ;;  %1144 = vmatprep.subr.bf16.mxu1 %v2974_v41 }
  0x46   :  { %1064 = vmatprep.subr.bf16.mxu0 %v2977_v40  ;;  %v81_v29 = vrot.slane %v3563_v27, %v3558_v26  ;;  %v85_v30 = vrot.slane %v3563_v27, %v3566_v28  ;;  %v93_v39 = vrot.slane %v3563_v27, %v3573_v31  ;;  %p3412_p5 = por %p3411_p4, %p3410_p3 }
  0x48   :  { %1145 = vmatpush1.bf16.msra.mxu1 %v2972_v42  ;;  %p3413_p6 = pnand %p3412_p5, %p3406_p2 }
  0x49   :  { %1065 = vmatpush1.bf16.msra.mxu0 %v2975_v43  ;;  %1146 = vmatprep.subr.bf16.mxu1 %v2980_v45  ;;  %v3041_v43 = vld [vmem:[#allocation2 + $0x200] ss:$16 sps:$4 sm:$0xff]  }
  0x4a   :  { %1066 = vmatprep.subr.bf16.mxu0 %v2983_v44  ;;  %v3044_v44 = vld [vmem:[#allocation2 + $0x208] ss:$16 sps:$4 sm:$0xff]  }
  0x4c   :  { %1147 = vmatpush1.bf16.msra.mxu1 %v2978_v46 }
  0x4d   :  { %1067 = vmatpush1.bf16.msra.mxu0 %v2981_v47  ;;  %1148 = vmatprep.subr.bf16.mxu1 %v2986_v49  ;;  %v3049_v47 = vld [vmem:[#allocation2 + $0x224] ss:$16 sps:$4 sm:$0xff]  }
  0x4e   :  { %1068 = vmatprep.subr.bf16.mxu0 %v2989_v48  ;;  %v3052_v48 = vld [vmem:[#allocation2 + $0x22c] ss:$16 sps:$4 sm:$0xff]  }
  0x50   :  { %1149 = vmatpush1.bf16.msra.mxu1 %v2984_v50 }
  0x51   :  { %1069 = vmatpush1.bf16.msra.mxu0 %v2987_v51  ;;  %1150 = vmatprep.subr.bf16.mxu1 %v2992_v53  ;;  %v3047_v53 = vld [vmem:[#allocation2 + $0x220] ss:$16 sps:$4 sm:$0xff]  }
  0x52   :  { %1070 = vmatprep.subr.bf16.mxu0 %v2995_v52 }
  0x54   :  { %1151 = vmatpush1.bf16.msra.mxu1 %v2990_v54  ;;  %v3050_v54 = vld [vmem:[#allocation2 + $0x228] ss:$16 sps:$4 sm:$0xff]  }
  0x55   :  { %1071 = vmatpush1.bf16.msra.mxu0 %v2993_v55  ;;  %1152 = vmatprep.subr.bf16.mxu1 %v2998_v57  ;;  %v3055_v55 = vld [vmem:[#allocation2 + $0x244] ss:$16 sps:$4 sm:$0xff]  }
  0x56   :  { %1072 = vmatprep.subr.bf16.mxu0 %v3001_v56  ;;  %v3058_v56 = vld [vmem:[#allocation2 + $0x24c] ss:$16 sps:$4 sm:$0xff]  }
  0x58   :  { %1153 = vmatpush1.bf16.msra.mxu1 %v2996_v59  ;;  %v3056_v59 = vld [vmem:[#allocation2 + $0x248] ss:$16 sps:$4 sm:$0xff]  }
  0x59   :  { %1073 = vmatpush1.bf16.msra.mxu0 %v2999_v58  ;;  %1154 = vmatprep.subr.bf16.mxu1 %v3004_v61  ;;  %v3053_v58 = vld [vmem:[#allocation2 + $0x240] ss:$16 sps:$4 sm:$0xff]   ;;  %v3064_v61 = vld [vmem:[#allocation2 + $0x26c] ss:$16 sps:$4 sm:$0xff]  }
  0x5a   :  { %1074 = vmatprep.subr.bf16.mxu0 %v3007_v60  ;;  %v3061_v60 = vld [vmem:[#allocation2 + $0x264] ss:$16 sps:$4 sm:$0xff]  }
  0x5c   :  { %1155 = vmatpush1.bf16.msra.mxu1 %v3002_v63  ;;  %v3062_v63 = vld [vmem:[#allocation2 + $0x268] ss:$16 sps:$4 sm:$0xff]  }
  0x5d   :  { %1075 = vmatpush1.bf16.msra.mxu0 %v3005_v62  ;;  %1156 = vmatprep.subr.bf16.mxu1 %v3010_v1  ;;  %v3059_v62 = vld [vmem:[#allocation2 + $0x260] ss:$16 sps:$4 sm:$0xff]   ;;  %v3070_v1 = vld [vmem:[#allocation2 + $0x28c] ss:$16 sps:$4 sm:$0xff]  }
  0x5e   :  { %1076 = vmatprep.subr.bf16.mxu0 %v3013_v0  ;;  %v3067_v0 = vld [vmem:[#allocation2 + $0x284] ss:$16 sps:$4 sm:$0xff]  }
  0x60   :  { %1157 = vmatpush1.bf16.msra.mxu1 %v3008_v3  ;;  %v3068_v3 = vld [vmem:[#allocation2 + $0x288] ss:$16 sps:$4 sm:$0xff]  }
  0x61   :  { %1077 = vmatpush1.bf16.msra.mxu0 %v3011_v2  ;;  %1158 = vmatprep.subr.bf16.mxu1 %v3016_v5  ;;  %v3065_v2 = vld [vmem:[#allocation2 + $0x280] ss:$16 sps:$4 sm:$0xff]   ;;  %v3076_v5 = vld [vmem:[#allocation2 + $0x2ac] ss:$16 sps:$4 sm:$0xff]  }
  0x62   :  { %1078 = vmatprep.subr.bf16.mxu0 %v3019_v4  ;;  %v3073_v4 = vld [vmem:[#allocation2 + $0x2a4] ss:$16 sps:$4 sm:$0xff]  }
  0x64   :  { %1159 = vmatpush1.bf16.msra.mxu1 %v3014_v7  ;;  %v3074_v7 = vld [vmem:[#allocation2 + $0x2a8] ss:$16 sps:$4 sm:$0xff]  }
  0x65   :  { %1079 = vmatpush1.bf16.msra.mxu0 %v3017_v6  ;;  %1160 = vmatprep.subr.bf16.mxu1 %v3022_v9  ;;  %v3071_v6 = vld [vmem:[#allocation2 + $0x2a0] ss:$16 sps:$4 sm:$0xff]   ;;  %v3082_v9 = vld [vmem:[#allocation2 + $0x2cc] ss:$16 sps:$4 sm:$0xff]  }
  0x66   :  { %1080 = vmatprep.subr.bf16.mxu0 %v3025_v8  ;;  %v3079_v8 = vld [vmem:[#allocation2 + $0x2c4] ss:$16 sps:$4 sm:$0xff]  }
  0x68   :  { %1161 = vmatpush1.bf16.msra.mxu1 %v3020_v11  ;;  %v3080_v11 = vld [vmem:[#allocation2 + $0x2c8] ss:$16 sps:$4 sm:$0xff]  }
  0x69   :  { %1081 = vmatpush1.bf16.msra.mxu0 %v3023_v10  ;;  %1162 = vmatprep.subr.bf16.mxu1 %v3028_v12  ;;  %v3077_v10 = vld [vmem:[#allocation2 + $0x2c0] ss:$16 sps:$4 sm:$0xff]   ;;  %v3085_v12 = vld [vmem:[#allocation2 + $0x2e4] ss:$16 sps:$4 sm:$0xff]  }
  0x6a   :  { %1082 = vmatprep.subr.bf16.mxu0 %v3031_v14  ;;  %v3083_v14 = vld [vmem:[#allocation2 + $0x2e0] ss:$16 sps:$4 sm:$0xff]  }
  0x6c   :  { %1163 = vmatpush1.bf16.msra.mxu1 %v3026_v13  ;;  %v3088_v13 = vld [vmem:[#allocation2 + $0x2ec] ss:$16 sps:$4 sm:$0xff]  }
  0x6d   :  { %1164 = vmatprep.subr.bf16.mxu1 %v3034_v15  ;;  %1083 = vmatpush1.bf16.msra.mxu0 %v3029_v16  ;;  %v3086_v15 = vld [vmem:[#allocation2 + $0x2e8] ss:$16 sps:$4 sm:$0xff]   ;;  %v3091_v16 = vld [vmem:[#allocation2 + $0x304] ss:$16 sps:$4 sm:$0xff]  }
  0x6e   :  { %1084 = vmatprep.subr.bf16.mxu0 %v3037_v18  ;;  %v3089_v18 = vld [vmem:[#allocation2 + $0x300] ss:$16 sps:$4 sm:$0xff]  }
  0x70   :  { %1165 = vmatpush1.bf16.msra.mxu1 %v3032_v17  ;;  %v3094_v17 = vld [vmem:[#allocation2 + $0x30c] ss:$16 sps:$4 sm:$0xff]  }
  0x71   :  { %1166 = vmatprep.subr.bf16.mxu1 %v3040_v19  ;;  %1085 = vmatpush1.bf16.msra.mxu0 %v3035_v20  ;;  %v3092_v19 = vld [vmem:[#allocation2 + $0x308] ss:$16 sps:$4 sm:$0xff]   ;;  %v3097_v20 = vld [vmem:[#allocation2 + $0x324] ss:$16 sps:$4 sm:$0xff]  }
  0x72   :  { %1095 = vmatprep.subr.bf16.mxu0 %v3043_v22  ;;  %v3095_v22 = vld [vmem:[#allocation2 + $0x320] ss:$16 sps:$4 sm:$0xff]  }
  0x74   :  { %1167 = vmatpush1.bf16.msra.mxu1 %v3038_v21  ;;  %v3100_v21 = vld [vmem:[#allocation2 + $0x32c] ss:$16 sps:$4 sm:$0xff]  }
  0x75   :  { %1177 = vmatprep.subr.bf16.mxu1 %v3046_v23  ;;  %v3098_v23 = vld [vmem:[#allocation2 + $0x328] ss:$16 sps:$4 sm:$0xff]  }
 0x107   :  { %v208_v32 = vpop.f32.mrb[0].mxu0 }
 0x108   :  { %v209_v33 = vadd.f32 %v208_v32, %v81_v29  ;;  %v210_v34 = vpop.f32.mrb[1].mxu0  ;;  %v3106_v29 = vld [vmem:[#allocation2 + $0x34c] ss:$16 sps:$4 sm:$0xff]   ;;  %v3104_v32 = vld [vmem:[#allocation2 + $0x348] ss:$16 sps:$4 sm:$0xff]  }
 0x109   :  { %v211_v35 = vadd.f32 %v210_v34, %v85_v30  ;;  %v212_v36 = vpop.f32.mrb[2].mxu0  ;;  %v3101_v30 = vld [vmem:[#allocation2 + $0x340] ss:$16 sps:$4 sm:$0xff]   ;;  %v3112_v34 = vld [vmem:[#allocation2 + $0x36c] ss:$16 sps:$4 sm:$0xff]  }
 0x10a   :  { %v256_v37 = vmax.f32 %v209_v33, 0.0  ;;  %v213_v38 = vpop.f32.mrb[3].mxu0  ;;  %v3577_v41 = vpop.f32.mrb[0].mxu1  ;;  %v3109_v33 = vld [vmem:[#allocation2 + $0x364] ss:$16 sps:$4 sm:$0xff]  }
 0x10b   :  { %v257_v40 = vmax.f32 %v211_v35, 0.0  ;;  %v251_v45 = vpop.f32.mrb[1].mxu1  ;;  %v3107_v35 = vld [vmem:[#allocation2 + $0x360] ss:$16 sps:$4 sm:$0xff]   ;;  %v3110_v36 = vld [vmem:[#allocation2 + $0x368] ss:$16 sps:$4 sm:$0xff]  }
 0x10c   :  { %v260_v46 = vpack.c.bf16 %v256_v37, %v256_v37  ;;  %v252_v49 = vadd.f32 %v251_v45, %v93_v39  ;;  %v253_v50 = vpop.f32.mrb[2].mxu1  ;;  %v3115_v37 = vld [vmem:[#allocation2 + $0x384] ss:$16 sps:$4 sm:$0xff]   ;;  %v3118_v38 = vld [vmem:[#allocation2 + $0x38c] ss:$16 sps:$4 sm:$0xff]  }
 0x10d   :  { %v261_v42 = vpack.c.bf16 %v257_v40, %v257_v40  ;;  %v254_v51 = vpop.f32.mrb[3].mxu1  ;;  %v3113_v39 = vld [vmem:[#allocation2 + $0x380] ss:$16 sps:$4 sm:$0xff]   ;;  %v3116_v40 = vld [vmem:[#allocation2 + $0x388] ss:$16 sps:$4 sm:$0xff]  }
 0x10e   :  { %v259_v52 = vmax.f32 %v252_v49, 0.0  ;;  %v3119_v45 = vld [vmem:[#allocation2 + $0x3a0] ss:$16 sps:$4 sm:$0xff]   ;;  %v3130_v49 = vld [vmem:[#allocation2 + $0x3cc] ss:$16 sps:$4 sm:$0xff]  }
 0x10f   :  { %1086 = vmatprep.mubr.bf16.mxu0 %v261_v42  ;;  %1168 = vmatprep.mubr.bf16.mxu1 %v261_v42  ;;  %v3580_v42 = vsub.s32 2, %v3555_v25  ;;  %v3125_v50 = vld [vmem:[#allocation2 + $0x3c0] ss:$16 sps:$4 sm:$0xff]   ;;  %v3128_v51 = vld [vmem:[#allocation2 + $0x3c8] ss:$16 sps:$4 sm:$0xff]  }
 0x110   :  { %1087 = vmatmul.mubr.bf16.vlgmr.msra.gmra.mrb[4].mxu0 %v260_v46  ;;  %1169 = vmatmul.mubr.bf16.vlgmr.msra.gmra.mrb[4].mxu1 %v260_v46  ;;  %v263_v57 = vpack.c.bf16 %v259_v52, %v259_v52  ;;  %v3122_v46 = vld [vmem:[#allocation2 + $0x3a8] ss:$16 sps:$4 sm:$0xff]   ;;  %v3133_v52 = vld [vmem:[#allocation2 + $0x3e4] ss:$16 sps:$4 sm:$0xff]  }
 0x111   :  { %1096 = vmatpush1.bf16.msra.mxu0 %v3041_v43  ;;  %1178 = vmatpush1.bf16.msra.mxu1 %v3044_v44  ;;  %v3121_v43 = vld [vmem:[#allocation2 + $0x3a4] ss:$16 sps:$4 sm:$0xff]   ;;  %v3124_v44 = vld [vmem:[#allocation2 + $0x3ac] ss:$16 sps:$4 sm:$0xff]  }
 0x112   :  { %1097 = vmatprep.subr.bf16.mxu0 %v3049_v47  ;;  %1179 = vmatprep.subr.bf16.mxu1 %v3052_v48  ;;  %v89_v47 = vrot.slane %v3563_v27, %v3580_v42  ;;  %v3127_v48 = vld [vmem:[#allocation2 + $0x3c4] ss:$16 sps:$4 sm:$0xff]  }
 0x113   :  { %1127 = vmatprep.mubr.bf16.mxu0 %v263_v57  ;;  %1209 = vmatprep.mubr.bf16.mxu1 %v263_v57  ;;  %v3139_v27 = vld [vmem:[#allocation5 + $0x4] ss:$16 sps:$4 sm:$0xff]   ;;  %v3142_v57 = vld [vmem:[#allocation5 + $0xc] ss:$16 sps:$4 sm:$0xff]  }
 0x114   :  { %v250_v25 = vadd.f32 %v3577_v41, %v89_v47  ;;  %v3145_v41 = vld [vmem:[#allocation5 + $0x24] ss:$16 sps:$4 sm:$0xff]  }
 0x115   :  { %1098 = vmatpush1.bf16.msra.mxu0 %v3047_v53  ;;  %1180 = vmatpush1.bf16.msra.mxu1 %v3050_v54  ;;  %v3136_v53 = vld [vmem:[#allocation2 + $0x3ec] ss:$16 sps:$4 sm:$0xff]   ;;  %v3131_v54 = vld [vmem:[#allocation2 + $0x3e0] ss:$16 sps:$4 sm:$0xff]   ;;  %v3211_v47 = vld [vmem:[#allocation5 + $0x184] ss:$16 sps:$4 sm:$0xff]  }
 0x116   :  { %1099 = vmatprep.subr.bf16.mxu0 %v3055_v55  ;;  %1181 = vmatprep.subr.bf16.mxu1 %v3058_v56  ;;  %v3134_v55 = vld [vmem:[#allocation2 + $0x3e8] ss:$16 sps:$4 sm:$0xff]   ;;  %v258_v56 = vmax.f32 %v250_v25, 0.0  ;;  %v3220_v25 = vld [vmem:[#allocation5 + $0x1ac] ss:$16 sps:$4 sm:$0xff]  }
 0x119   :  { %1100 = vmatpush1.bf16.msra.mxu0 %v3053_v58  ;;  %1182 = vmatpush1.bf16.msra.mxu1 %v3056_v59  ;;  %v3137_v58 = vld [vmem:[#allocation5] ss:$16 sps:$4 sm:$0xff]   ;;  %v3140_v59 = vld [vmem:[#allocation5 + $0x8] ss:$16 sps:$4 sm:$0xff]  }
 0x11a   :  { %1101 = vmatprep.subr.bf16.mxu0 %v3061_v60  ;;  %1183 = vmatprep.subr.bf16.mxu1 %v3064_v61  ;;  %v262_v60 = vpack.c.bf16 %v258_v56, %v258_v56  ;;  %v3148_v61 = vld [vmem:[#allocation5 + $0x2c] ss:$16 sps:$4 sm:$0xff]   ;;  %v3221_v56 = vld [vmem:[#allocation5 + $0x1c0] ss:$16 sps:$4 sm:$0xff]  }
 0x11d   :  { %1102 = vmatpush1.bf16.msra.mxu0 %v3059_v62  ;;  %1184 = vmatpush1.bf16.msra.mxu1 %v3062_v63  ;;  %v3143_v62 = vld [vmem:[#allocation5 + $0x20] ss:$16 sps:$4 sm:$0xff]   ;;  %v3146_v63 = vld [vmem:[#allocation5 + $0x28] ss:$16 sps:$4 sm:$0xff]  }
 0x11e   :  { %1103 = vmatprep.subr.bf16.mxu0 %v3067_v0  ;;  %1185 = vmatprep.subr.bf16.mxu1 %v3070_v1  ;;  %v3151_v0 = vld [vmem:[#allocation5 + $0x44] ss:$16 sps:$4 sm:$0xff]   ;;  %v3154_v1 = vld [vmem:[#allocation5 + $0x4c] ss:$16 sps:$4 sm:$0xff]  }
 0x121   :  { %1104 = vmatpush1.bf16.msra.mxu0 %v3065_v2  ;;  %1186 = vmatpush1.bf16.msra.mxu1 %v3068_v3  ;;  %v3149_v2 = vld [vmem:[#allocation5 + $0x40] ss:$16 sps:$4 sm:$0xff]   ;;  %v3152_v3 = vld [vmem:[#allocation5 + $0x48] ss:$16 sps:$4 sm:$0xff]  }
 0x122   :  { %1105 = vmatprep.subr.bf16.mxu0 %v3073_v4  ;;  %1187 = vmatprep.subr.bf16.mxu1 %v3076_v5  ;;  %v3157_v4 = vld [vmem:[#allocation5 + $0x64] ss:$16 sps:$4 sm:$0xff]   ;;  %v3160_v5 = vld [vmem:[#allocation5 + $0x6c] ss:$16 sps:$4 sm:$0xff]  }
 0x125   :  { %1106 = vmatpush1.bf16.msra.mxu0 %v3071_v6  ;;  %1188 = vmatpush1.bf16.msra.mxu1 %v3074_v7  ;;  %v3155_v6 = vld [vmem:[#allocation5 + $0x60] ss:$16 sps:$4 sm:$0xff]   ;;  %v3158_v7 = vld [vmem:[#allocation5 + $0x68] ss:$16 sps:$4 sm:$0xff]  }
 0x126   :  { %1107 = vmatprep.subr.bf16.mxu0 %v3079_v8  ;;  %1189 = vmatprep.subr.bf16.mxu1 %v3082_v9  ;;  %v3163_v8 = vld [vmem:[#allocation5 + $0x84] ss:$16 sps:$4 sm:$0xff]   ;;  %v3166_v9 = vld [vmem:[#allocation5 + $0x8c] ss:$16 sps:$4 sm:$0xff]  }
 0x129   :  { %1108 = vmatpush1.bf16.msra.mxu0 %v3077_v10  ;;  %1190 = vmatpush1.bf16.msra.mxu1 %v3080_v11  ;;  %v3161_v10 = vld [vmem:[#allocation5 + $0x80] ss:$16 sps:$4 sm:$0xff]   ;;  %v3164_v11 = vld [vmem:[#allocation5 + $0x88] ss:$16 sps:$4 sm:$0xff]  }
 0x12a   :  { %1109 = vmatprep.subr.bf16.mxu0 %v3085_v12  ;;  %1191 = vmatprep.subr.bf16.mxu1 %v3088_v13  ;;  %v3169_v12 = vld [vmem:[#allocation5 + $0xa4] ss:$16 sps:$4 sm:$0xff]   ;;  %v3172_v13 = vld [vmem:[#allocation5 + $0xac] ss:$16 sps:$4 sm:$0xff]  }
 0x12d   :  { %1110 = vmatpush1.bf16.msra.mxu0 %v3083_v14  ;;  %1192 = vmatpush1.bf16.msra.mxu1 %v3086_v15  ;;  %v3167_v14 = vld [vmem:[#allocation5 + $0xa0] ss:$16 sps:$4 sm:$0xff]   ;;  %v3170_v15 = vld [vmem:[#allocation5 + $0xa8] ss:$16 sps:$4 sm:$0xff]  }
 0x12e   :  { %1111 = vmatprep.subr.bf16.mxu0 %v3091_v16  ;;  %1193 = vmatprep.subr.bf16.mxu1 %v3094_v17  ;;  %v3175_v16 = vld [vmem:[#allocation5 + $0xc4] ss:$16 sps:$4 sm:$0xff]   ;;  %v3178_v17 = vld [vmem:[#allocation5 + $0xcc] ss:$16 sps:$4 sm:$0xff]  }
 0x131   :  { %1112 = vmatpush1.bf16.msra.mxu0 %v3089_v18  ;;  %1194 = vmatpush1.bf16.msra.mxu1 %v3092_v19  ;;  %v3173_v18 = vld [vmem:[#allocation5 + $0xc0] ss:$16 sps:$4 sm:$0xff]   ;;  %v3176_v19 = vld [vmem:[#allocation5 + $0xc8] ss:$16 sps:$4 sm:$0xff]  }
 0x132   :  { %1113 = vmatprep.subr.bf16.mxu0 %v3097_v20  ;;  %1195 = vmatprep.subr.bf16.mxu1 %v3100_v21  ;;  %v3181_v20 = vld [vmem:[#allocation5 + $0xe4] ss:$16 sps:$4 sm:$0xff]   ;;  %v3184_v21 = vld [vmem:[#allocation5 + $0xec] ss:$16 sps:$4 sm:$0xff]  }
 0x135   :  { %1114 = vmatpush1.bf16.msra.mxu0 %v3095_v22  ;;  %1196 = vmatpush1.bf16.msra.mxu1 %v3098_v23  ;;  %v3179_v22 = vld [vmem:[#allocation5 + $0xe0] ss:$16 sps:$4 sm:$0xff]   ;;  %v3182_v23 = vld [vmem:[#allocation5 + $0xe8] ss:$16 sps:$4 sm:$0xff]  }
 0x136   :  { %1115 = vmatprep.subr.bf16.mxu0 %v3103_v24  ;;  %1197 = vmatprep.subr.bf16.mxu1 %v3106_v29  ;;  %v3187_v24 = vld [vmem:[#allocation5 + $0x104] ss:$16 sps:$4 sm:$0xff]   ;;  %v3190_v29 = vld [vmem:[#allocation5 + $0x10c] ss:$16 sps:$4 sm:$0xff]  }
 0x139   :  { %1116 = vmatpush1.bf16.msra.mxu0 %v3101_v30  ;;  %1198 = vmatpush1.bf16.msra.mxu1 %v3104_v32  ;;  %v3185_v30 = vld [vmem:[#allocation5 + $0x100] ss:$16 sps:$4 sm:$0xff]   ;;  %v3188_v32 = vld [vmem:[#allocation5 + $0x108] ss:$16 sps:$4 sm:$0xff]  }
 0x13a   :  { %1117 = vmatprep.subr.bf16.mxu0 %v3109_v33  ;;  %1199 = vmatprep.subr.bf16.mxu1 %v3112_v34  ;;  %v3193_v33 = vld [vmem:[#allocation5 + $0x124] ss:$16 sps:$4 sm:$0xff]   ;;  %v3196_v34 = vld [vmem:[#allocation5 + $0x12c] ss:$16 sps:$4 sm:$0xff]  }
 0x13d   :  { %1118 = vmatpush1.bf16.msra.mxu0 %v3107_v35  ;;  %1200 = vmatpush1.bf16.msra.mxu1 %v3110_v36  ;;  %v3191_v35 = vld [vmem:[#allocation5 + $0x120] ss:$16 sps:$4 sm:$0xff]   ;;  %v3194_v36 = vld [vmem:[#allocation5 + $0x128] ss:$16 sps:$4 sm:$0xff]  }
 0x13e   :  { %1119 = vmatprep.subr.bf16.mxu0 %v3115_v37  ;;  %1201 = vmatprep.subr.bf16.mxu1 %v3118_v38  ;;  %v3199_v37 = vld [vmem:[#allocation5 + $0x144] ss:$16 sps:$4 sm:$0xff]   ;;  %v3202_v38 = vld [vmem:[#allocation5 + $0x14c] ss:$16 sps:$4 sm:$0xff]  }
 0x141   :  { %1120 = vmatpush1.bf16.msra.mxu0 %v3113_v39  ;;  %1202 = vmatpush1.bf16.msra.mxu1 %v3116_v40  ;;  %v3197_v39 = vld [vmem:[#allocation5 + $0x140] ss:$16 sps:$4 sm:$0xff]   ;;  %v3200_v40 = vld [vmem:[#allocation5 + $0x148] ss:$16 sps:$4 sm:$0xff]  }
 0x142   :  { %1121 = vmatprep.subr.bf16.mxu0 %v3121_v43  ;;  %1203 = vmatprep.subr.bf16.mxu1 %v3124_v44  ;;  %v3205_v43 = vld [vmem:[#allocation5 + $0x164] ss:$16 sps:$4 sm:$0xff]   ;;  %v3208_v44 = vld [vmem:[#allocation5 + $0x16c] ss:$16 sps:$4 sm:$0xff]  }
 0x145   :  { %1122 = vmatpush1.bf16.msra.mxu0 %v3119_v45  ;;  %1204 = vmatpush1.bf16.msra.mxu1 %v3122_v46  ;;  %v3203_v45 = vld [vmem:[#allocation5 + $0x160] ss:$16 sps:$4 sm:$0xff]   ;;  %v3206_v46 = vld [vmem:[#allocation5 + $0x168] ss:$16 sps:$4 sm:$0xff]  }
 0x146   :  { %1123 = vmatprep.subr.bf16.mxu0 %v3127_v48  ;;  %1205 = vmatprep.subr.bf16.mxu1 %v3130_v49  ;;  %v3214_v48 = vld [vmem:[#allocation5 + $0x18c] ss:$16 sps:$4 sm:$0xff]   ;;  %v3209_v49 = vld [vmem:[#allocation5 + $0x180] ss:$16 sps:$4 sm:$0xff]  }
 0x149   :  { %1124 = vmatpush1.bf16.msra.mxu0 %v3125_v50  ;;  %1206 = vmatpush1.bf16.msra.mxu1 %v3128_v51  ;;  %v3212_v50 = vld [vmem:[#allocation5 + $0x188] ss:$16 sps:$4 sm:$0xff]   ;;  %v3217_v51 = vld [vmem:[#allocation5 + $0x1a4] ss:$16 sps:$4 sm:$0xff]  }
 0x14a   :  { %1125 = vmatprep.subr.bf16.mxu0 %v3133_v52  ;;  %1207 = vmatprep.subr.bf16.mxu1 %v3136_v53  ;;  %v3215_v52 = vld [vmem:[#allocation5 + $0x1a0] ss:$16 sps:$4 sm:$0xff]   ;;  %v3218_v53 = vld [vmem:[#allocation5 + $0x1a8] ss:$16 sps:$4 sm:$0xff]  }
 0x14d   :  { %1126 = vmatpush1.bf16.msra.mxu0 %v3131_v54  ;;  %1208 = vmatpush1.bf16.msra.mxu1 %v3134_v55  ;;  %v3223_v54 = vld [vmem:[#allocation5 + $0x1c4] ss:$16 sps:$4 sm:$0xff]   ;;  %v3226_v55 = vld [vmem:[#allocation5 + $0x1cc] ss:$16 sps:$4 sm:$0xff]  }
 0x14e   :  { %2016 = vmatprep.subr.bf16.mxu0 %v3139_v27  ;;  %2098 = vmatprep.subr.bf16.mxu1 %v3142_v57  ;;  %v3224_v27 = vld [vmem:[#allocation5 + $0x1c8] ss:$16 sps:$4 sm:$0xff]   ;;  %v3229_v57 = vld [vmem:[#allocation5 + $0x1e4] ss:$16 sps:$4 sm:$0xff]  }
 0x150   :  { %1128 = vmatmul.mubr.bf16.vlgmr.msra.gmra.mrb[4].mxu0 %v262_v60  ;;  %1210 = vmatmul.mubr.bf16.vlgmr.msra.gmra.mrb[4].mxu1 %v262_v60  ;;  %v3230_v60 = vld [vmem:[#allocation5 + $0x1e8] ss:$16 sps:$4 sm:$0xff]  }
 0x151   :  { %2017 = vmatpush1.bf16.msra.mxu0 %v3137_v58  ;;  %2099 = vmatpush1.bf16.msra.mxu1 %v3140_v59  ;;  %v3232_v58 = vld [vmem:[#allocation5 + $0x1ec] ss:$16 sps:$4 sm:$0xff]   ;;  %v3227_v59 = vld [vmem:[#allocation5 + $0x1e0] ss:$16 sps:$4 sm:$0xff]  }
 0x152   :  { %2018 = vmatprep.subr.bf16.mxu0 %v3145_v41  ;;  %2100 = vmatprep.subr.bf16.mxu1 %v3148_v61  ;;  %v3235_v41 = vld [vmem:[#allocation5 + $0x204] ss:$16 sps:$4 sm:$0xff]   ;;  %v3238_v61 = vld [vmem:[#allocation5 + $0x20c] ss:$16 sps:$4 sm:$0xff]  }
 0x155   :  { %2019 = vmatpush1.bf16.msra.mxu0 %v3143_v62  ;;  %2101 = vmatpush1.bf16.msra.mxu1 %v3146_v63  ;;  %v3588_v62 = vld [vmem:[%s3723_s4] sm:$0xf] }
 0x156   :  { %2020 = vmatprep.subr.bf16.mxu0 %v3151_v0  ;;  %2102 = vmatprep.subr.bf16.mxu1 %v3154_v1  ;;  %v397_v63 = vrot.slane %v3588_v62, %v3558_v26  ;;  %v401_v0 = vrot.slane %v3588_v62, %v3566_v28  ;;  %v409_v1 = vrot.slane %v3588_v62, %v3573_v31 }
 0x159   :  { %2021 = vmatpush1.bf16.msra.mxu0 %v3149_v2  ;;  %2103 = vmatpush1.bf16.msra.mxu1 %v3152_v3 }
 0x15a   :  { %2022 = vmatprep.subr.bf16.mxu0 %v3157_v4  ;;  %2104 = vmatprep.subr.bf16.mxu1 %v3160_v5 }
 0x15d   :  { %2023 = vmatpush1.bf16.msra.mxu0 %v3155_v6  ;;  %2105 = vmatpush1.bf16.msra.mxu1 %v3158_v7 }
 0x15e   :  { %2024 = vmatprep.subr.bf16.mxu0 %v3163_v8  ;;  %2106 = vmatprep.subr.bf16.mxu1 %v3166_v9 }
 0x161   :  { %2025 = vmatpush1.bf16.msra.mxu0 %v3161_v10  ;;  %2107 = vmatpush1.bf16.msra.mxu1 %v3164_v11 }
 0x162   :  { %2026 = vmatprep.subr.bf16.mxu0 %v3169_v12  ;;  %2108 = vmatprep.subr.bf16.mxu1 %v3172_v13 }
 0x165   :  { %2027 = vmatpush1.bf16.msra.mxu0 %v3167_v14  ;;  %2109 = vmatpush1.bf16.msra.mxu1 %v3170_v15 }
 0x166   :  { %2028 = vmatprep.subr.bf16.mxu0 %v3175_v16  ;;  %2110 = vmatprep.subr.bf16.mxu1 %v3178_v17  ;;  %v3233_v17 = vld [vmem:[#allocation5 + $0x200] ss:$16 sps:$4 sm:$0xff]  }
 0x169   :  { %2029 = vmatpush1.bf16.msra.mxu0 %v3173_v18  ;;  %2111 = vmatpush1.bf16.msra.mxu1 %v3176_v19  ;;  %v3236_v18 = vld [vmem:[#allocation5 + $0x208] ss:$16 sps:$4 sm:$0xff]  }
 0x16a   :  { %2030 = vmatprep.subr.bf16.mxu0 %v3181_v20  ;;  %2112 = vmatprep.subr.bf16.mxu1 %v3184_v21  ;;  %v3241_v20 = vld [vmem:[#allocation5 + $0x224] ss:$16 sps:$4 sm:$0xff]   ;;  %v3244_v21 = vld [vmem:[#allocation5 + $0x22c] ss:$16 sps:$4 sm:$0xff]  }
 0x16d   :  { %2031 = vmatpush1.bf16.msra.mxu0 %v3179_v22  ;;  %2113 = vmatpush1.bf16.msra.mxu1 %v3182_v23  ;;  %v3239_v23 = vld [vmem:[#allocation5 + $0x220] ss:$16 sps:$4 sm:$0xff]  }
 0x16e   :  { %2032 = vmatprep.subr.bf16.mxu0 %v3187_v24  ;;  %2114 = vmatprep.subr.bf16.mxu1 %v3190_v29  ;;  %v3242_v24 = vld [vmem:[#allocation5 + $0x228] ss:$16 sps:$4 sm:$0xff]   ;;  %v3247_v29 = vld [vmem:[#allocation5 + $0x244] ss:$16 sps:$4 sm:$0xff]  }
 0x171   :  { %2033 = vmatpush1.bf16.msra.mxu0 %v3185_v30  ;;  %2115 = vmatpush1.bf16.msra.mxu1 %v3188_v32  ;;  %v3250_v30 = vld [vmem:[#allocation5 + $0x24c] ss:$16 sps:$4 sm:$0xff]   ;;  %v3245_v32 = vld [vmem:[#allocation5 + $0x240] ss:$16 sps:$4 sm:$0xff]  }
 0x172   :  { %2034 = vmatprep.subr.bf16.mxu0 %v3193_v33  ;;  %2116 = vmatprep.subr.bf16.mxu1 %v3196_v34  ;;  %v3248_v33 = vld [vmem:[#allocation5 + $0x248] ss:$16 sps:$4 sm:$0xff]   ;;  %v3253_v34 = vld [vmem:[#allocation5 + $0x264] ss:$16 sps:$4 sm:$0xff]  }
 0x175   :  { %2035 = vmatpush1.bf16.msra.mxu0 %v3191_v35  ;;  %2117 = vmatpush1.bf16.msra.mxu1 %v3194_v36  ;;  %v3256_v35 = vld [vmem:[#allocation5 + $0x26c] ss:$16 sps:$4 sm:$0xff]   ;;  %v3251_v36 = vld [vmem:[#allocation5 + $0x260] ss:$16 sps:$4 sm:$0xff]  }
 0x176   :  { %2036 = vmatprep.subr.bf16.mxu0 %v3199_v37  ;;  %2118 = vmatprep.subr.bf16.mxu1 %v3202_v38  ;;  %v3254_v37 = vld [vmem:[#allocation5 + $0x268] ss:$16 sps:$4 sm:$0xff]   ;;  %v3259_v38 = vld [vmem:[#allocation5 + $0x284] ss:$16 sps:$4 sm:$0xff]  }
 0x179   :  { %2037 = vmatpush1.bf16.msra.mxu0 %v3197_v39  ;;  %2119 = vmatpush1.bf16.msra.mxu1 %v3200_v40  ;;  %v3262_v39 = vld [vmem:[#allocation5 + $0x28c] ss:$16 sps:$4 sm:$0xff]   ;;  %v3257_v40 = vld [vmem:[#allocation5 + $0x280] ss:$16 sps:$4 sm:$0xff]  }
 0x17a   :  { %2038 = vmatprep.subr.bf16.mxu0 %v3205_v43  ;;  %2120 = vmatprep.subr.bf16.mxu1 %v3208_v44  ;;  %v3260_v43 = vld [vmem:[#allocation5 + $0x288] ss:$16 sps:$4 sm:$0xff]   ;;  %v3265_v44 = vld [vmem:[#allocation5 + $0x2a4] ss:$16 sps:$4 sm:$0xff]  }
 0x17d   :  { %2039 = vmatpush1.bf16.msra.mxu0 %v3203_v45  ;;  %2121 = vmatpush1.bf16.msra.mxu1 %v3206_v46  ;;  %v3268_v45 = vld [vmem:[#allocation5 + $0x2ac] ss:$16 sps:$4 sm:$0xff]   ;;  %v3263_v46 = vld [vmem:[#allocation5 + $0x2a0] ss:$16 sps:$4 sm:$0xff]  }
 0x17e   :  { %2040 = vmatprep.subr.bf16.mxu0 %v3211_v47  ;;  %2122 = vmatprep.subr.bf16.mxu1 %v3214_v48  ;;  %v3266_v47 = vld [vmem:[#allocation5 + $0x2a8] ss:$16 sps:$4 sm:$0xff]   ;;  %v3271_v48 = vld [vmem:[#allocation5 + $0x2c4] ss:$16 sps:$4 sm:$0xff]  }
 0x181   :  { %2041 = vmatpush1.bf16.msra.mxu0 %v3209_v49  ;;  %2123 = vmatpush1.bf16.msra.mxu1 %v3212_v50  ;;  %v3274_v49 = vld [vmem:[#allocation5 + $0x2cc] ss:$16 sps:$4 sm:$0xff]   ;;  %v3269_v50 = vld [vmem:[#allocation5 + $0x2c0] ss:$16 sps:$4 sm:$0xff]  }
 0x182   :  { %2042 = vmatprep.subr.bf16.mxu0 %v3217_v51  ;;  %2124 = vmatprep.subr.bf16.mxu1 %v3220_v25  ;;  %v3272_v51 = vld [vmem:[#allocation5 + $0x2c8] ss:$16 sps:$4 sm:$0xff]   ;;  %v3277_v25 = vld [vmem:[#allocation5 + $0x2e4] ss:$16 sps:$4 sm:$0xff]  }
 0x185   :  { %2043 = vmatpush1.bf16.msra.mxu0 %v3215_v52  ;;  %2125 = vmatpush1.bf16.msra.mxu1 %v3218_v53  ;;  %v3280_v52 = vld [vmem:[#allocation5 + $0x2ec] ss:$16 sps:$4 sm:$0xff]   ;;  %v3275_v53 = vld [vmem:[#allocation5 + $0x2e0] ss:$16 sps:$4 sm:$0xff]  }
 0x186   :  { %2044 = vmatprep.subr.bf16.mxu0 %v3223_v54  ;;  %2126 = vmatprep.subr.bf16.mxu1 %v3226_v55  ;;  %v3278_v54 = vld [vmem:[#allocation5 + $0x2e8] ss:$16 sps:$4 sm:$0xff]   ;;  %v3283_v55 = vld [vmem:[#allocation5 + $0x304] ss:$16 sps:$4 sm:$0xff]  }
 0x189   :  { %2045 = vmatpush1.bf16.msra.mxu0 %v3221_v56  ;;  %2127 = vmatpush1.bf16.msra.mxu1 %v3224_v27  ;;  %v3286_v56 = vld [vmem:[#allocation5 + $0x30c] ss:$16 sps:$4 sm:$0xff]   ;;  %v3281_v27 = vld [vmem:[#allocation5 + $0x300] ss:$16 sps:$4 sm:$0xff]  }
 0x18a   :  { %2046 = vmatprep.subr.bf16.mxu0 %v3229_v57  ;;  %2128 = vmatprep.subr.bf16.mxu1 %v3232_v58  ;;  %v3284_v57 = vld [vmem:[#allocation5 + $0x308] ss:$16 sps:$4 sm:$0xff]   ;;  %v3289_v58 = vld [vmem:[#allocation5 + $0x324] ss:$16 sps:$4 sm:$0xff]  }
 0x18d   :  { %2047 = vmatpush1.bf16.msra.mxu0 %v3227_v59  ;;  %2129 = vmatpush1.bf16.msra.mxu1 %v3230_v60  ;;  %v3292_v59 = vld [vmem:[#allocation5 + $0x32c] ss:$16 sps:$4 sm:$0xff]   ;;  %v3287_v60 = vld [vmem:[#allocation5 + $0x320] ss:$16 sps:$4 sm:$0xff]  }
 0x18e   :  { %2057 = vmatprep.subr.bf16.mxu0 %v3235_v41  ;;  %2139 = vmatprep.subr.bf16.mxu1 %v3238_v61  ;;  %v3290_v41 = vld [vmem:[#allocation5 + $0x328] ss:$16 sps:$4 sm:$0xff]   ;;  %v3295_v61 = vld [vmem:[#allocation5 + $0x344] ss:$16 sps:$4 sm:$0xff]  }
 0x223   :  { %v1129_v2 = vpop.f32.mrb[4].mxu0  ;;  %v3596_v3 = vpop.f32.mrb[4].mxu1 }
 0x224   :  { %v2896_v4 = vadd.f32 %v1129_v2, %v397_v63  ;;  %v1131_v5 = vpop.f32.mrb[5].mxu0  ;;  %v1213_v6 = vpop.f32.mrb[5].mxu1  ;;  %v3298_v63 = vld [vmem:[#allocation5 + $0x34c] ss:$16 sps:$4 sm:$0xff]   ;;  %v3301_v2 = vld [vmem:[#allocation5 + $0x364] ss:$16 sps:$4 sm:$0xff]  }
 0x225   :  { %v2897_v7 = vadd.f32 %v1131_v5, %v401_v0  ;;  %v2899_v8 = vadd.f32 %v1213_v6, %v409_v1  ;;  %v1133_v9 = vpop.f32.mrb[6].mxu0  ;;  %v1215_v10 = vpop.f32.mrb[6].mxu1  ;;  %v3293_v0 = vld [vmem:[#allocation5 + $0x340] ss:$16 sps:$4 sm:$0xff]   ;;  %v3296_v1 = vld [vmem:[#allocation5 + $0x348] ss:$16 sps:$4 sm:$0xff]  }
 0x226   :  { %v1218_v11 = vmax.f32 %v2896_v4, 0.0  ;;  %v1134_v12 = vpop.f32.mrb[7].mxu0  ;;  %v1216_v13 = vpop.f32.mrb[7].mxu1  ;;  %v3304_v4 = vld [vmem:[#allocation5 + $0x36c] ss:$16 sps:$4 sm:$0xff]  }
 0x227   :  { %v1219_v14 = vmax.f32 %v2897_v7, 0.0  ;;  %v1221_v15 = vmax.f32 %v2899_v8, 0.0  ;;  %v3299_v5 = vld [vmem:[#allocation5 + $0x360] ss:$16 sps:$4 sm:$0xff]   ;;  %v3302_v6 = vld [vmem:[#allocation5 + $0x368] ss:$16 sps:$4 sm:$0xff]  }
 0x228   :  { %v1222_v19 = vpack.c.bf16 %v1218_v11, %v1218_v11  ;;  %v3307_v7 = vld [vmem:[#allocation5 + $0x384] ss:$16 sps:$4 sm:$0xff]   ;;  %v3310_v8 = vld [vmem:[#allocation5 + $0x38c] ss:$16 sps:$4 sm:$0xff]   ;;  %v3305_v9 = vld [vmem:[#allocation5 + $0x380] ss:$16 sps:$4 sm:$0xff]  }
 0x229   :  { %v1223_v16 = vpack.c.bf16 %v1219_v14, %v1219_v14  ;;  %v1225_v22 = vpack.c.bf16 %v1221_v15, %v1221_v15  ;;  %v3308_v10 = vld [vmem:[#allocation5 + $0x388] ss:$16 sps:$4 sm:$0xff]   ;;  %v3313_v11 = vld [vmem:[#allocation5 + $0x3a4] ss:$16 sps:$4 sm:$0xff]   ;;  %v3316_v12 = vld [vmem:[#allocation5 + $0x3ac] ss:$16 sps:$4 sm:$0xff]   ;;  %v405_v15 = vrot.slane %v3588_v62, %v3580_v42 }
 0x22a   :  { %v3311_v13 = vld [vmem:[#allocation5 + $0x3a0] ss:$16 sps:$4 sm:$0xff]   ;;  %v3314_v14 = vld [vmem:[#allocation5 + $0x3a8] ss:$16 sps:$4 sm:$0xff]  }
 0x22b   :  { %2048 = vmatprep.mubr.bf16.mxu0 %v1223_v16  ;;  %2130 = vmatprep.mubr.bf16.mxu1 %v1223_v16  ;;  %v3319_v16 = vld [vmem:[#allocation5 + $0x3c4] ss:$16 sps:$4 sm:$0xff]  }
 0x22c   :  { %2049 = vmatmul.mubr.bf16.vlgmr.msra.gmra.mrb[8].mxu0 %v1222_v19  ;;  %2131 = vmatmul.mubr.bf16.vlgmr.msra.gmra.mrb[8].mxu1 %v1222_v19  ;;  %v3320_v19 = vld [vmem:[#allocation5 + $0x3c8] ss:$16 sps:$4 sm:$0xff]   ;;  %v3329_v62 = vld [vmem:[%s3726_s7 + $0x40] sm:$0xff]  }
 0x22d   :  { %2058 = vmatpush1.bf16.msra.mxu0 %v3233_v17  ;;  %2140 = vmatpush1.bf16.msra.mxu1 %v3236_v18  ;;  %v3322_v17 = vld [vmem:[#allocation5 + $0x3cc] ss:$16 sps:$4 sm:$0xff]   ;;  %v3317_v18 = vld [vmem:[#allocation5 + $0x3c0] ss:$16 sps:$4 sm:$0xff]  }
 0x22e   :  { %2089 = vmatprep.mubr.bf16.mxu0 %v1225_v22  ;;  %2171 = vmatprep.mubr.bf16.mxu1 %v1225_v22  ;;  %v3328_v22 = vld [vmem:[#allocation5 + $0x3ec] ss:$16 sps:$4 sm:$0xff]  }
 0x22f   :  { %2059 = vmatprep.subr.bf16.mxu0 %v3241_v20  ;;  %2141 = vmatprep.subr.bf16.mxu1 %v3244_v21  ;;  %v2898_v20 = vadd.f32 %v3596_v3, %v405_v15  ;;  %v3325_v21 = vld [vmem:[#allocation5 + $0x3e4] ss:$16 sps:$4 sm:$0xff]  }
 0x230   :  { %v3331_v3 = vld [vmem:[%s3726_s7] sm:$0xff]  }
 0x231   :  { %2060 = vmatpush1.bf16.msra.mxu0 %v3239_v23  ;;  %2142 = vmatpush1.bf16.msra.mxu1 %v3242_v24  ;;  %v3323_v23 = vld [vmem:[#allocation5 + $0x3e0] ss:$16 sps:$4 sm:$0xff]   ;;  %v3326_v24 = vld [vmem:[#allocation5 + $0x3e8] ss:$16 sps:$4 sm:$0xff]  }
 0x232   :  { %2061 = vmatprep.subr.bf16.mxu0 %v3247_v29  ;;  %2143 = vmatprep.subr.bf16.mxu1 %v3250_v30  ;;  %v1220_v29 = vmax.f32 %v2898_v20, 0.0  ;;  %v3330_v30 = vld [vmem:[%s3726_s7 + $0xc0] sm:$0xff]  }
 0x235   :  { %2062 = vmatpush1.bf16.msra.mxu0 %v3245_v32  ;;  %2144 = vmatpush1.bf16.msra.mxu1 %v3248_v33  ;;  %v3332_v32 = vld [vmem:[%s3726_s7 + $0x80] sm:$0xff]   ;;  %v1224_v33 = vpack.c.bf16 %v1220_v29, %v1220_v29 }
 0x236   :  { %2063 = vmatprep.subr.bf16.mxu0 %v3253_v34  ;;  %2145 = vmatprep.subr.bf16.mxu1 %v3256_v35  ;;  %v3333_v34 = vld [vmem:[%s3726_s7 + $0x48] sm:$0xff]  }
 0x237   :  { %v3334_v35 = vld [vmem:[%s3726_s7 + $0xc8] sm:$0xff]  }
 0x239   :  { %2064 = vmatpush1.bf16.msra.mxu0 %v3251_v36  ;;  %2146 = vmatpush1.bf16.msra.mxu1 %v3254_v37  ;;  %v3335_v36 = vld [vmem:[%s3726_s7 + $0x8] sm:$0xff]  }
 0x23a   :  { %2065 = vmatprep.subr.bf16.mxu0 %v3259_v38  ;;  %2147 = vmatprep.subr.bf16.mxu1 %v3262_v39  ;;  %v3336_v37 = vld [vmem:[%s3726_s7 + $0x88] sm:$0xff]   ;;  %v3337_v38 = vld [vmem:[%s3726_s7 + $0x50] sm:$0xff]  }
 0x23b   :  { %v3338_v39 = vld [vmem:[%s3726_s7 + $0xd0] sm:$0xff]  }
 0x23d   :  { %2066 = vmatpush1.bf16.msra.mxu0 %v3257_v40  ;;  %2148 = vmatpush1.bf16.msra.mxu1 %v3260_v43  ;;  %v3339_v40 = vld [vmem:[%s3726_s7 + $0x10] sm:$0xff]  }
 0x23e   :  { %2067 = vmatprep.subr.bf16.mxu0 %v3265_v44  ;;  %2149 = vmatprep.subr.bf16.mxu1 %v3268_v45  ;;  %v3340_v43 = vld [vmem:[%s3726_s7 + $0x90] sm:$0xff]   ;;  %v3341_v44 = vld [vmem:[%s3726_s7 + $0x58] sm:$0xff]  }
 0x23f   :  { %v3342_v45 = vld [vmem:[%s3726_s7 + $0xd8] sm:$0xff]  }
 0x241   :  { %2068 = vmatpush1.bf16.msra.mxu0 %v3263_v46  ;;  %2150 = vmatpush1.bf16.msra.mxu1 %v3266_v47  ;;  %v3343_v46 = vld [vmem:[%s3726_s7 + $0x18] sm:$0xff]  }
 0x242   :  { %2069 = vmatprep.subr.bf16.mxu0 %v3271_v48  ;;  %2151 = vmatprep.subr.bf16.mxu1 %v3274_v49  ;;  %v3344_v47 = vld [vmem:[%s3726_s7 + $0x98] sm:$0xff]   ;;  %v3345_v48 = vld [vmem:[%s3726_s7 + $0x60] sm:$0xff]  }
 0x243   :  { %v3346_v49 = vld [vmem:[%s3726_s7 + $0xe0] sm:$0xff]  }
 0x245   :  { %2070 = vmatpush1.bf16.msra.mxu0 %v3269_v50  ;;  %2152 = vmatpush1.bf16.msra.mxu1 %v3272_v51  ;;  %v3347_v50 = vld [vmem:[%s3726_s7 + $0x20] sm:$0xff]  }
 0x246   :  { %2071 = vmatprep.subr.bf16.mxu0 %v3277_v25  ;;  %2153 = vmatprep.subr.bf16.mxu1 %v3280_v52  ;;  %v3348_v51 = vld [vmem:[%s3726_s7 + $0xa0] sm:$0xff]   ;;  %v3349_v25 = vld [vmem:[%s3726_s7 + $0x68] sm:$0xff]  }
 0x247   :  { %v3350_v52 = vld [vmem:[%s3726_s7 + $0xe8] sm:$0xff]  }
 0x249   :  { %2072 = vmatpush1.bf16.msra.mxu0 %v3275_v53  ;;  %2154 = vmatpush1.bf16.msra.mxu1 %v3278_v54  ;;  %v3351_v53 = vld [vmem:[%s3726_s7 + $0x28] sm:$0xff]  }
 0x24a   :  { %2073 = vmatprep.subr.bf16.mxu0 %v3283_v55  ;;  %2155 = vmatprep.subr.bf16.mxu1 %v3286_v56  ;;  %v3352_v54 = vld [vmem:[%s3726_s7 + $0xa8] sm:$0xff]   ;;  %v3353_v55 = vld [vmem:[%s3726_s7 + $0x70] sm:$0xff]  }
 0x24b   :  { %v3354_v56 = vld [vmem:[%s3726_s7 + $0xf0] sm:$0xff]  }
 0x24d   :  { %2074 = vmatpush1.bf16.msra.mxu0 %v3281_v27  ;;  %2156 = vmatpush1.bf16.msra.mxu1 %v3284_v57  ;;  %v3355_v27 = vld [vmem:[%s3726_s7 + $0x30] sm:$0xff]  }
 0x24e   :  { %2075 = vmatprep.subr.bf16.mxu0 %v3289_v58  ;;  %2157 = vmatprep.subr.bf16.mxu1 %v3292_v59  ;;  %v3356_v57 = vld [vmem:[%s3726_s7 + $0xb0] sm:$0xff]   ;;  %v3357_v58 = vld [vmem:[%s3726_s7 + $0x78] sm:$0xff]  }
 0x24f   :  { %v3358_v59 = vld [vmem:[%s3726_s7 + $0xf8] sm:$0xff]  }
 0x251   :  { %2076 = vmatpush1.bf16.msra.mxu0 %v3287_v60  ;;  %2158 = vmatpush1.bf16.msra.mxu1 %v3290_v41  ;;  %v3359_v60 = vld [vmem:[%s3726_s7 + $0x38] sm:$0xff]  }
 0x252   :  { %2077 = vmatprep.subr.bf16.mxu0 %v3295_v61  ;;  %2159 = vmatprep.subr.bf16.mxu1 %v3298_v63  ;;  %v3360_v41 = vld [vmem:[%s3726_s7 + $0xb8] sm:$0xff]   ;;  %v1354_v61 = vld [vmem:[%s3725_s6] sm:$0xf] }
 0x253   :  { %v1359_v63 = vrot.slane %v1354_v61, %v3558_v26 }
 0x255   :  { %2078 = vmatpush1.bf16.msra.mxu0 %v3293_v0  ;;  %2160 = vmatpush1.bf16.msra.mxu1 %v3296_v1  ;;  %v1367_v0 = vrot.slane %v1354_v61, %v3580_v42  ;;  %v1363_v1 = vrot.slane %v1354_v61, %v3566_v28 }
 0x256   :  { %2079 = vmatprep.subr.bf16.mxu0 %v3301_v2  ;;  %2161 = vmatprep.subr.bf16.mxu1 %v3304_v4  ;;  %v1371_v2 = vrot.slane %v1354_v61, %v3573_v31 }
 0x259   :  { %2080 = vmatpush1.bf16.msra.mxu0 %v3299_v5  ;;  %2162 = vmatpush1.bf16.msra.mxu1 %v3302_v6 }
 0x25a   :  { %2081 = vmatprep.subr.bf16.mxu0 %v3307_v7  ;;  %2163 = vmatprep.subr.bf16.mxu1 %v3310_v8 }
 0x25d   :  { %2082 = vmatpush1.bf16.msra.mxu0 %v3305_v9  ;;  %2164 = vmatpush1.bf16.msra.mxu1 %v3308_v10 }
 0x25e   :  { %2083 = vmatprep.subr.bf16.mxu0 %v3313_v11  ;;  %2165 = vmatprep.subr.bf16.mxu1 %v3316_v12 }
 0x261   :  { %2084 = vmatpush1.bf16.msra.mxu0 %v3311_v13  ;;  %2166 = vmatpush1.bf16.msra.mxu1 %v3314_v14 }
 0x262   :  { %2085 = vmatprep.subr.bf16.mxu0 %v3319_v16  ;;  %2167 = vmatprep.subr.bf16.mxu1 %v3322_v17 }
 0x265   :  { %2086 = vmatpush1.bf16.msra.mxu0 %v3317_v18  ;;  %2168 = vmatpush1.bf16.msra.mxu1 %v3320_v19 }
 0x266   :  { %2087 = vmatprep.subr.bf16.mxu0 %v3325_v21  ;;  %2169 = vmatprep.subr.bf16.mxu1 %v3328_v22  ;;  %v2819_v22 = vld [vmem:[%s3727_s8] ss:$0 sm:$0xff] }
 0x269   :  { %2088 = vmatpush1.bf16.msra.mxu0 %v3323_v23  ;;  %2170 = vmatpush1.bf16.msra.mxu1 %v3326_v24 }
 0x26a   :  { %2852 = vmatprep.subr.bf16.mxu0 %v3329_v62  ;;  %2874 = vmatprep.subr.bf16.mxu1 %v3330_v30 }
 0x26c   :  { %2090 = vmatmul.mubr.bf16.vlgmr.msra.gmra.mrb[8].mxu0 %v1224_v33  ;;  %2172 = vmatmul.mubr.bf16.vlgmr.msra.gmra.mrb[8].mxu1 %v1224_v33 }
 0x26d   :  { %2853 = vmatpush3.bf16.msra.mxu0 %v3331_v3  ;;  %2875 = vmatpush3.bf16.msra.mxu1 %v3332_v32 }
 0x26e   :  { %2854 = vmatprep.subr.bf16.mxu0 %v3333_v34  ;;  %2876 = vmatprep.subr.bf16.mxu1 %v3334_v35 }
 0x271   :  { %2855 = vmatpush3.bf16.msra.mxu0 %v3335_v36  ;;  %2877 = vmatpush3.bf16.msra.mxu1 %v3336_v37 }
 0x272   :  { %2856 = vmatprep.subr.bf16.mxu0 %v3337_v38  ;;  %2878 = vmatprep.subr.bf16.mxu1 %v3338_v39 }
 0x275   :  { %2857 = vmatpush3.bf16.msra.mxu0 %v3339_v40  ;;  %2879 = vmatpush3.bf16.msra.mxu1 %v3340_v43 }
 0x276   :  { %2858 = vmatprep.subr.bf16.mxu0 %v3341_v44  ;;  %2880 = vmatprep.subr.bf16.mxu1 %v3342_v45 }
 0x279   :  { %2859 = vmatpush3.bf16.msra.mxu0 %v3343_v46  ;;  %2881 = vmatpush3.bf16.msra.mxu1 %v3344_v47 }
 0x27a   :  { %2860 = vmatprep.subr.bf16.mxu0 %v3345_v48  ;;  %2882 = vmatprep.subr.bf16.mxu1 %v3346_v49 }
 0x27d   :  { %2861 = vmatpush3.bf16.msra.mxu0 %v3347_v50  ;;  %2883 = vmatpush3.bf16.msra.mxu1 %v3348_v51 }
 0x27e   :  { %2862 = vmatprep.subr.bf16.mxu0 %v3349_v25  ;;  %2884 = vmatprep.subr.bf16.mxu1 %v3350_v52 }
 0x281   :  { %2863 = vmatpush3.bf16.msra.mxu0 %v3351_v53  ;;  %2885 = vmatpush3.bf16.msra.mxu1 %v3352_v54 }
 0x282   :  { %2864 = vmatprep.subr.bf16.mxu0 %v3353_v55  ;;  %2886 = vmatprep.subr.bf16.mxu1 %v3354_v56 }
 0x285   :  { %2865 = vmatpush3.bf16.msra.mxu0 %v3355_v27  ;;  %2887 = vmatpush3.bf16.msra.mxu1 %v3356_v57 }
 0x286   :  { %2866 = vmatprep.subr.bf16.mxu0 %v3357_v58  ;;  %2888 = vmatprep.subr.bf16.mxu1 %v3358_v59 }
 0x289   :  { %2867 = vmatpush3.bf16.msra.mxu0 %v3359_v60  ;;  %2889 = vmatpush3.bf16.msra.mxu1 %v3360_v41 }
 0x33f   :  { %v2091_v4 = vpop.f32.mrb[8].mxu0  ;;  %v2173_v5 = vpop.f32.mrb[8].mxu1 }
 0x340   :  { %v2900_v6 = vadd.f32 %v2091_v4, %v1359_v63  ;;  %v2902_v7 = vadd.f32 %v2173_v5, %v1367_v0  ;;  %v2093_v8 = vpop.f32.mrb[9].mxu0  ;;  %v2175_v9 = vpop.f32.mrb[9].mxu1 }
 0x341   :  { %v2901_v10 = vadd.f32 %v2093_v8, %v1363_v1  ;;  %v2903_v11 = vadd.f32 %v2175_v9, %v1371_v2  ;;  %v2095_v12 = vpop.f32.mrb[10].mxu0  ;;  %v2177_v13 = vpop.f32.mrb[10].mxu1 }
 0x342   :  { %v2180_v14 = vmax.f32 %v2900_v6, 0.0  ;;  %v2182_v15 = vmax.f32 %v2902_v7, 0.0  ;;  %v2096_v16 = vpop.f32.mrb[11].mxu0  ;;  %v2178_v26 = vpop.f32.mrb[11].mxu1 }
 0x343   :  { %v2181_v17 = vmax.f32 %v2901_v10, 0.0  ;;  %v2183_v42 = vmax.f32 %v2903_v11, 0.0 }
 0x344   :  { %v2184_v19 = vpack.c.bf16 %v2180_v14, %v2180_v14  ;;  %v2186_v31 = vpack.c.bf16 %v2182_v15, %v2182_v15 }
 0x345   :  { %v2185_v18 = vpack.c.bf16 %v2181_v17, %v2181_v17  ;;  %v2187_v28 = vpack.c.bf16 %v2183_v42, %v2183_v42 }
 0x347   :  { %2483 = vmatprep.mubr.bf16.mxu0 %v2185_v18  ;;  %2523 = vmatprep.mubr.bf16.mxu1 %v2187_v28 }
 0x348   :  { %2484 = vmatmul.mubr.bf16.vlgmr.msra.gmra.mrb[12].mxu0 %v2184_v19  ;;  %2524 = vmatmul.mubr.bf16.vlgmr.msra.gmra.mrb[12].mxu1 %v2186_v31 }
 0x41b   :  { %v2868_v20 = vpop.f32.mrb[12].mxu0  ;;  %v2890_v21 = vpop.f32.mrb[12].mxu1 }
 0x41c   :  { %v2869_v23 = vpop.f32.mrb[13].mxu0  ;;  %v2891_v24 = vpop.f32.mrb[13].mxu1 }
 0x41d   :  { %v2870_v29 = vadd.f32 %v2869_v23, %v2868_v20  ;;  %v2892_v62 = vadd.f32 %v2891_v24, %v2890_v21  ;;  %v2871_v30 = vpop.f32.mrb[14].mxu0  ;;  %v2893_v3 = vpop.f32.mrb[14].mxu1 }
 0x41e   :  { %v2872_v32 = vpop.f32.mrb[15].mxu0  ;;  %v2894_v33 = vpop.f32.mrb[15].mxu1 }
 0x41f   :  { %v2486_v34 = vadd.f32 %v2870_v29, %v2819_v22 }
 0x421   :  { %v2526_v35 = vadd.f32 %v2892_v62, %v2486_v34 }
 0x423   :  { %2532 = vst.msk [vmem:[#allocation7] sm:$0xff] %vm2531_vm3, %v2526_v35 }
 0x424   :  { %3416 = shalt.err (!%p3413_p6)
}
 0x425   :  { %s3417_s11 = scalar_lea.hbm %s3728_s9, 128 }
 0x426   :  { %p3418_p7 = scmp.ne.s32.totalorder %s3728_s9, %s3417_s11  ;;  %p3421_p8 = scmp.lt.u32.totalorder %s3417_s11, %s3728_s9 }
 0x428   :  { %p3423_p9 = pnand %p3421_p8, %p3418_p7 }
 0x42a   :  { %3426 = shalt.err (!%p3423_p9)
}
 0x42b   :  { %2542 = dma.vmem_to_hbm [thread:$0]  %s2540_s28, 128, %s3728_s9, [#allocation4]  }
 0x42c   :  { %3431 = dma.done.wait [#allocation4], 128  }
 0x42d   :  { %3432 = vsyncadd [#allocation4], 4294967168 }
 0x42e   :  { %2546 = vsyncpa [#allocation3], 1 }
 0x42f   :  { %2547 = vsyncpa [#allocation6], 1 }
 0x430   :  { %2548 = vsyncpa [#allocation4], 1 }

</bundles_post_ra>
